<compile_context>
chip_gen: v7x
topology: tpu7x:2x2x1
jax: 0.10.0
libtpu: 0.0.40
codegen_flags: <defaults>
</compile_context>

<pallas_src>
import functools

import jax
import jax.numpy as jnp
import numpy as np
from jax.experimental import pallas as pl
from jax.experimental.pallas import tpu as pltpu

BN_EPS = 1e-5        # nn.BatchNorm1d default eps
NORM_EPS = 1e-12     # F.normalize default eps


def _round_up(n, m=128):
    return ((n + m - 1) // m) * m


# ---------------------------------------------------------------------------
# Fused kernel: grid = (batch tiles, HID chunks)
# ---------------------------------------------------------------------------
def fused_kernel(
    x_ref,        # [TB, C*HW]        bf16 (GAP folded into w_bb)
    w_bb_ref,     # [C*HW, F]         bf16
    b_bb_ref,     # [1, F]            f32
    w_lin_ref,    # [F, NCP]          bf16
    b_lin_ref,    # [1, NCP]          f32
    w_pf_ref,     # [F, HC]           bf16 (BN folded, HID chunk)
    b_pf_ref,     # [1, HC]           f32
    w_cs_ref,     # [HC, CSP]         bf16 (cluster ++ subspace, HID chunk)
    b_cs_ref,     # [1, CSP]          f32
    out_ref,      # [TB, NCP+CLP+ZP]  f32 (logits ++ cluster ++ z)
    feat_sc,      # VMEM [TB, F]      bf16
    acc_sc,       # VMEM [TB, CSP]    f32
    *, ncp, clp,
):
    h = pl.program_id(1)

    @pl.when(h == 0)
    def _():
        # stand-in backbone: GAP is folded into the weights -> one lane-dense matmul
        feat = (
            jnp.dot(x_ref[...], w_bb_ref[...], preferred_element_type=jnp.float32)
            + b_bb_ref[...]
        )
        feat_bf = jnp.maximum(feat, 0.0).astype(jnp.bfloat16)   # [TB, F]
        feat_sc[...] = feat_bf

        # predict_logits = self.linear(feature)  (lane-padded, first NCP lanes of out)
        out_ref[:, :ncp] = (
            jnp.dot(feat_bf, w_lin_ref[...], preferred_element_type=jnp.float32)
            + b_lin_ref[...]
        )
        acc_sc[...] = jnp.zeros_like(acc_sc)

    # pre_feature chunk (Linear + folded BN + ReLU) fused with the partial
    # (cluster ++ subspace) accumulate: the full [TB, 4096] f32 `pre` never materializes.
    pre = (
        jnp.dot(feat_sc[...], w_pf_ref[...], preferred_element_type=jnp.float32)
        + b_pf_ref[...]
    )
    pre = jnp.maximum(pre, 0.0)                                  # [TB, HC] f32
    acc_sc[...] += jnp.dot(pre.astype(jnp.bfloat16), w_cs_ref[...],
                           preferred_element_type=jnp.float32)

    @pl.when(h == pl.num_programs(1) - 1)
    def _():
        cs = acc_sc[...] + b_cs_ref[...]                         # [TB, CLP+ZP]
        out_ref[:, ncp:ncp + clp] = cs[:, :clp]                  # cluster_logits

        # z = F.normalize(subspace(pre_feature), p=2): rsqrt (EUP) + multiply.
        # Padded subspace columns carry zero weight/bias so the norm is exact.
        z = cs[:, clp:]
        sumsq = jnp.sum(z * z, axis=-1, keepdims=True)
        inv = jax.lax.rsqrt(jnp.maximum(sumsq, NORM_EPS * NORM_EPS))
        out_ref[:, ncp + clp:] = z * inv


# ---------------------------------------------------------------------------
# One-time parameter preparation (fold GAP + BN, transpose to [in,out], pad, concat, bf16)
# ---------------------------------------------------------------------------
def prepare_params(p, hw):
    """From PyTorch-convention params to kernel-ready tensors. Runs once, eagerly."""
    num_classes = p["w_lin"].shape[0]
    n_clusters = p["w_cl"].shape[0]
    z_dim = p["w_sub"].shape[0]
    ncp, clp, zp = _round_up(num_classes), _round_up(n_clusters), _round_up(z_dim)

    def pad_cols(w, to):                       # w: [in, n] -> [in, to]
        return w if w.shape[1] == to else jnp.pad(w, ((0, 0), (0, to - w.shape[1])))

    def pad_vec(b, to):
        return b if b.shape[0] == to else jnp.pad(b, (0, to - b.shape[0]))

    # Fold global-average-pool into the stand-in backbone weight:
    # mean_{hw}(x) @ W  ==  reshape(x, [B, C*HW]) @ (repeat(W, HW, axis=0) / HW)
    w_bb = jnp.repeat(p["w_bb"], hw, axis=0) / float(hw)          # [C*HW, F]

    # Fold eval-mode BatchNorm1d into the pre_feature Linear.
    scale = p["bn_gamma"] * jax.lax.rsqrt(p["bn_var"] + BN_EPS)   # [HID]
    w_pf = p["w_pf"].T * scale[None, :]                           # [F, HID]
    b_pf = (p["b_pf"] - p["bn_mean"]) * scale + p["bn_beta"]      # [HID]

    # Classifier head, padded to 128 lanes.
    w_lin = pad_cols(p["w_lin"].T, ncp)
    b_lin = pad_vec(p["b_lin"], ncp)

    # Cluster + subspace heads concatenated into one lane-dense matmul.
    w_cs = jnp.concatenate(
        [pad_cols(p["w_cl"].T, clp), pad_cols(p["w_sub"].T, zp)], axis=1)   # [HID, CLP+ZP]
    b_cs = jnp.concatenate([pad_vec(p["b_cl"], clp), pad_vec(p["b_sub"], zp)], axis=0)

    prep = {
        "w_bb": w_bb.astype(jnp.bfloat16),
        "b_bb": p["b_bb"].reshape(1, -1).astype(jnp.float32),
        "w_lin": w_lin.astype(jnp.bfloat16),
        "b_lin": b_lin.reshape(1, -1).astype(jnp.float32),
        "w_pf": w_pf.astype(jnp.bfloat16),
        "b_pf": b_pf.reshape(1, -1).astype(jnp.float32),
        "w_cs": w_cs.astype(jnp.bfloat16),
        "b_cs": b_cs.reshape(1, -1).astype(jnp.float32),
    }
    dims = dict(num_classes=num_classes, n_clusters=n_clusters, z_dim=z_dim)
    return prep, dims


# ---------------------------------------------------------------------------
# Forward wrapper: single fused pallas_call, grid = (batch tiles, HID chunks)
# ---------------------------------------------------------------------------
@functools.partial(jax.jit, static_argnames=("num_classes", "n_clusters", "z_dim"))
def multiple_task_network_forward(x_nchw, prep, *, num_classes, n_clusters, z_dim):
    """return_info == 'return_supervised_and_clustering_and_subspace'."""
    B, C, H, W = x_nchw.shape
    CHW = C * H * W
    F = prep["w_bb"].shape[1]
    HID = prep["w_pf"].shape[1]
    NCP = prep["w_lin"].shape[1]
    CSP = prep["w_cs"].shape[1]
    CLP = _round_up(n_clusters)
    ZP = _round_up(z_dim)
    OUTW = NCP + CLP + ZP
    assert CSP == CLP + ZP and prep["w_bb"].shape[0] == CHW

    # NCHW -> [B, C*H*W]: pure reshape; bf16 halves the HBM->VMEM input stream
    # (kernel accumulates in f32).
    x = x_nchw.reshape(B, CHW).astype(jnp.bfloat16)

    # Batch tile: >=2 tiles whenever B > 8 so v7x's two TensorCores both get work;
    # tiles grow to 256 rows at large batch to keep v6e's 256-row MXU fed.
    if B <= 8:
        TB = B
    else:
        TB = min(256, _round_up((B + 1) // 2, 8))
    nb = pl.cdiv(B, TB)

    # HID chunk width for the fused pre_feature -> (cluster ++ subspace) pipeline.
    HC = next((c for c in (512, 256, 128) if HID % c == 0), HID)
    nh = HID // HC

    kernel = functools.partial(fused_kernel, ncp=NCP, clp=CLP)

    out = pl.pallas_call(
        kernel,
        grid=(nb, nh),
        in_specs=[
            pl.BlockSpec((TB, CHW), lambda i, h: (i, 0)),    # activations tile over batch
            pl.BlockSpec((CHW, F), lambda i, h: (0, 0)),     # GAP-folded backbone weight
            pl.BlockSpec((1, F), lambda i, h: (0, 0)),
            pl.BlockSpec((F, NCP), lambda i, h: (0, 0)),     # classifier head
            pl.BlockSpec((1, NCP), lambda i, h: (0, 0)),
            pl.BlockSpec((F, HC), lambda i, h: (0, h)),      # pre_feature, HID-chunked
            pl.BlockSpec((1, HC), lambda i, h: (0, h)),
            pl.BlockSpec((HC, CSP), lambda i, h: (h, 0)),    # cluster++subspace, HID-chunked
            pl.BlockSpec((1, CSP), lambda i, h: (0, 0)),
        ],
        out_specs=pl.BlockSpec((TB, OUTW), lambda i, h: (i, 0)),
        out_shape=jax.ShapeDtypeStruct((B, OUTW), jnp.float32),
        scratch_shapes=[
            pltpu.VMEM((TB, F), jnp.bfloat16),               # cached feature
            pltpu.VMEM((TB, CSP), jnp.float32),              # cluster++subspace accumulator
        ],
        compiler_params=pltpu.CompilerParams(
            dimension_semantics=("parallel", "arbitrary"),   # batch tiles -> 2 TCs on v7x
            vmem_limit_bytes=32 * 1024 * 1024,               # footprint << 8 MiB; headroom kept
        ),
    )(
        x,
        prep["w_bb"], prep["b_bb"],
        prep["w_lin"], prep["b_lin"],
        prep["w_pf"], prep["b_pf"],
        prep["w_cs"], prep["b_cs"],
    )

    # Split the single lane-dense output slab; strip lane padding.
    logits = out[:, :num_classes]
    cluster = out[:, NCP:NCP + n_clusters]
    z = out[:, NCP + CLP:NCP + CLP + z_dim]
    return logits, cluster, z


# ---------------------------------------------------------------------------
# Deterministic parameter construction (PyTorch __init__ shapes / conventions)
# ---------------------------------------------------------------------------
def init_params(key, c_in, feature_dim, num_classes, hidden, n_clusters, z_dim):
    ks = jax.random.split(key, 5)

    def linear_init(k, out_f, in_f):
        bound = 1.0 / np.sqrt(in_f)
        kw, kb = jax.random.split(k)
        w = jax.random.uniform(kw, (out_f, in_f), jnp.float32, -bound, bound)
        b = jax.random.uniform(kb, (out_f,), jnp.float32, -bound, bound)
        return w, b

    w_bb, b_bb = linear_init(ks[0], feature_dim, c_in)           # stand-in backbone proj
    w_lin, b_lin = linear_init(ks[1], num_classes, feature_dim)  # self.linear
    w_pf, b_pf = linear_init(ks[2], hidden, feature_dim)         # pre_feature Linear
    w_cl, b_cl = linear_init(ks[3], n_clusters, hidden)          # self.cluster
    w_sub, b_sub = linear_init(ks[4], z_dim, hidden)             # self.subspace

    return {
        "w_bb": w_bb.T,                      # [c_in, feature_dim] (already [in, out])
        "b_bb": b_bb,
        "w_lin": w_lin, "b_lin": b_lin,      # [out, in] PyTorch convention
        "w_pf": w_pf, "b_pf": b_pf,
        "bn_gamma": jnp.ones((hidden,), jnp.float32),   # BatchNorm1d defaults
        "bn_beta": jnp.zeros((hidden,), jnp.float32),
        "bn_mean": jnp.zeros((hidden,), jnp.float32),
        "bn_var": jnp.ones((hidden,), jnp.float32),
        "w_cl": w_cl, "b_cl": b_cl,
        "w_sub": w_sub, "b_sub": b_sub,
    }


# ---------------------------------------------------------------------------
# Plain-JAX reference (for a sanity check of kernel semantics)
# ---------------------------------------------------------------------------
def reference_forward(x_nchw, p):
    pooled = jnp.mean(x_nchw, axis=(2, 3))                              # [B, C]
    feature = jnp.maximum(pooled @ p["w_bb"] + p["b_bb"], 0.0)

    logits = feature @ p["w_lin"].T + p["b_lin"]
    pre = feature @ p["w_pf"].T + p["b_pf"]
    pre = (pre - p["bn_mean"]) / jnp.sqrt(p["bn_var"] + BN_EPS)
    pre = pre * p["bn_gamma"] + p["bn_beta"]
    pre = jnp.maximum(pre, 0.0)
    cluster = pre @ p["w_cl"].T + p["b_cl"]
    z = pre @ p["w_sub"].T + p["b_sub"]
    z = z / jnp.maximum(jnp.linalg.norm(z, axis=-1, keepdims=True), NORM_EPS)
    return logits, cluster, z


# ---------------------------------------------------------------------------
if __name__ == "__main__":
    B, C, H, W = 8, 4, 16, 16
    feature_dim = 128
    hidden = 4096          # module spec: pre_feature = Linear(feature_dim, 4096)
    num_classes = 10
    n_clusters = 10
    z_dim = 128

    key = jax.random.PRNGKey(0)
    kx, kp = jax.random.split(key)
    x = jax.random.normal(kx, (B, C, H, W), jnp.float32)
    params = init_params(kp, C, feature_dim, num_classes, hidden, n_clusters, z_dim)

    # one-time: fold GAP + BN, transpose, pad, concat, bf16
    prep, dims = prepare_params(params, H * W)

    logits, cluster_logits, z = multiple_task_network_forward(x, prep, **dims)
    jax.block_until_ready((logits, cluster_logits, z))

    ref_logits, ref_cluster, ref_z = reference_forward(x, params)
    # bf16 MXU inputs (f32 accumulation) vs. f32 reference -> slightly loose tolerances.
    np.testing.assert_allclose(np.asarray(logits), np.asarray(ref_logits), rtol=2e-2, atol=2e-2)
    np.testing.assert_allclose(np.asarray(cluster_logits), np.asarray(ref_cluster), rtol=2e-2, atol=2e-2)
    np.testing.assert_allclose(np.asarray(z), np.asarray(ref_z), rtol=2e-2, atol=2e-2)

    print("KERNEL_OK")
</pallas_src>

<mosaic_0001>
module attributes {stable_mosaic.version = 11 : i64} {
  func.func @fused_kernel(%arg0: i32, %arg1: i32, %arg2: memref<8x1024xbf16, #tpu.memory_space<vmem>>, %arg3: memref<1024x128xbf16, #tpu.memory_space<vmem>>, %arg4: memref<1x128xf32, #tpu.memory_space<vmem>>, %arg5: memref<128x128xbf16, #tpu.memory_space<vmem>>, %arg6: memref<1x128xf32, #tpu.memory_space<vmem>>, %arg7: memref<128x512xbf16, #tpu.memory_space<vmem>>, %arg8: memref<1x512xf32, #tpu.memory_space<vmem>>, %arg9: memref<512x256xbf16, #tpu.memory_space<vmem>>, %arg10: memref<1x256xf32, #tpu.memory_space<vmem>>, %arg11: memref<8x384xf32, #tpu.memory_space<vmem>>, %arg12: memref<8x128xbf16, #tpu.memory_space<vmem>>, %arg13: memref<8x256xf32, #tpu.memory_space<vmem>>) attributes {dimension_semantics = [#tpu.dimension_semantics<parallel>, #tpu.dimension_semantics<arbitrary>], iteration_bounds = array<i64: 1, 8>, scalar_prefetch = 0 : i64, scratch_operands = 2 : i64, tpu.core_type = #tpu.core_type<tc>, window_params = [{transform_indices = @transform_0, window_bounds = array<i64: 8, 1024>}, {pipeline_mode = #tpu.pipeline_mode<synchronous>, transform_indices = @transform_1, window_bounds = array<i64: 1024, 128>}, {pipeline_mode = #tpu.pipeline_mode<synchronous>, transform_indices = @transform_2, window_bounds = array<i64: 1, 128>}, {pipeline_mode = #tpu.pipeline_mode<synchronous>, transform_indices = @transform_3, window_bounds = array<i64: 128, 128>}, {pipeline_mode = #tpu.pipeline_mode<synchronous>, transform_indices = @transform_4, window_bounds = array<i64: 1, 128>}, {transform_indices = @transform_5, window_bounds = array<i64: 128, 512>}, {transform_indices = @transform_6, window_bounds = array<i64: 1, 512>}, {transform_indices = @transform_7, window_bounds = array<i64: 512, 256>}, {pipeline_mode = #tpu.pipeline_mode<synchronous>, transform_indices = @transform_8, window_bounds = array<i64: 1, 256>}, {transform_indices = @transform_9, window_bounds = array<i64: 8, 384>}]} {
    %c0_i32 = arith.constant 0 : i32
    %0 = arith.cmpi eq, %arg1, %c0_i32 : i32
    %1 = arith.extui %0 : i1 to i32
    %c0_i32_0 = arith.constant 0 : i32
    %2 = arith.cmpi ne, %1, %c0_i32_0 : i32
    scf.if %2 {
      %c0_15 = arith.constant 0 : index
      %c0_16 = arith.constant 0 : index
      %20 = vector.load %arg2[%c0_15, %c0_16] : memref<8x1024xbf16, #tpu.memory_space<vmem>>, vector<8x1024xbf16>
      %c0_17 = arith.constant 0 : index
      %c0_18 = arith.constant 0 : index
      %21 = vector.load %arg3[%c0_17, %c0_18] : memref<1024x128xbf16, #tpu.memory_space<vmem>>, vector<1024x128xbf16>
      %cst_19 = arith.constant dense<0.000000e+00> : vector<8x128xf32>
      %22 = tpu.matmul %20, %21, %cst_19 {dimension_numbers = #tpu.dot_dimension_numbers<[1], [0], [0], [1], [0, 0, 1, 1], [], []>} : vector<8x1024xbf16>, vector<1024x128xbf16>, vector<8x128xf32> -> vector<8x128xf32>
      %c0_20 = arith.constant 0 : index
      %c0_21 = arith.constant 0 : index
      %23 = vector.load %arg4[%c0_20, %c0_21] : memref<1x128xf32, #tpu.memory_space<vmem>>, vector<1x128xf32>
      %24 = vector.broadcast %23 : vector<1x128xf32> to vector<8x128xf32>
      %25 = arith.addf %22, %24 : vector<8x128xf32>
      %cst_22 = arith.constant 0.000000e+00 : f32
      %26 = vector.broadcast %cst_22 : f32 to vector<8x128xf32>
      %27 = arith.maximumf %25, %26 : vector<8x128xf32>
      %28 = arith.truncf %27 : vector<8x128xf32> to vector<8x128xbf16>
      %c0_23 = arith.constant 0 : index
      %c0_24 = arith.constant 0 : index
      %29 = vector.load %arg12[%c0_23, %c0_24] : memref<8x128xbf16, #tpu.memory_space<vmem>>, vector<8x128xbf16>
      tpu.vector_store %arg12[%c0_23, %c0_24], %28 {strides = array<i32>} : memref<8x128xbf16, #tpu.memory_space<vmem>>, vector<8x128xbf16>,
      %c0_25 = arith.constant 0 : index
      %c0_26 = arith.constant 0 : index
      %30 = vector.load %arg5[%c0_25, %c0_26] : memref<128x128xbf16, #tpu.memory_space<vmem>>, vector<128x128xbf16>
      %cst_27 = arith.constant dense<0.000000e+00> : vector<8x128xf32>
      %31 = tpu.matmul %28, %30, %cst_27 {dimension_numbers = #tpu.dot_dimension_numbers<[1], [0], [0], [1], [0, 0, 1, 1], [], []>} : vector<8x128xbf16>, vector<128x128xbf16>, vector<8x128xf32> -> vector<8x128xf32>
      %c0_28 = arith.constant 0 : index
      %c0_29 = arith.constant 0 : index
      %32 = vector.load %arg6[%c0_28, %c0_29] : memref<1x128xf32, #tpu.memory_space<vmem>>, vector<1x128xf32>
      %33 = vector.broadcast %32 : vector<1x128xf32> to vector<8x128xf32>
      %34 = arith.addf %31, %33 : vector<8x128xf32>
      %c0_30 = arith.constant 0 : index
      %c0_31 = arith.constant 0 : index
      %35 = vector.load %arg11[%c0_30, %c0_31] : memref<8x384xf32, #tpu.memory_space<vmem>>, vector<8x128xf32>
      tpu.vector_store %arg11[%c0_30, %c0_31], %34 {strides = array<i32>} : memref<8x384xf32, #tpu.memory_space<vmem>>, vector<8x128xf32>,
      %cst_32 = arith.constant 0.000000e+00 : f32
      %36 = vector.broadcast %cst_32 : f32 to vector<8x256xf32>
      %c0_33 = arith.constant 0 : index
      %c0_34 = arith.constant 0 : index
      %37 = vector.load %arg13[%c0_33, %c0_34] : memref<8x256xf32, #tpu.memory_space<vmem>>, vector<8x256xf32>
      tpu.vector_store %arg13[%c0_33, %c0_34], %36 {strides = array<i32>} : memref<8x256xf32, #tpu.memory_space<vmem>>, vector<8x256xf32>,
    } else {
    }
    %c0 = arith.constant 0 : index
    %c0_1 = arith.constant 0 : index
    %3 = vector.load %arg12[%c0, %c0_1] : memref<8x128xbf16, #tpu.memory_space<vmem>>, vector<8x128xbf16>
    %c0_2 = arith.constant 0 : index
    %c0_3 = arith.constant 0 : index
    %4 = vector.load %arg7[%c0_2, %c0_3] : memref<128x512xbf16, #tpu.memory_space<vmem>>, vector<128x512xbf16>
    %cst = arith.constant dense<0.000000e+00> : vector<8x512xf32>
    %5 = tpu.matmul %3, %4, %cst {dimension_numbers = #tpu.dot_dimension_numbers<[1], [0], [0], [1], [0, 0, 1, 1], [], []>} : vector<8x128xbf16>, vector<128x512xbf16>, vector<8x512xf32> -> vector<8x512xf32>
    %c0_4 = arith.constant 0 : index
    %c0_5 = arith.constant 0 : index
    %6 = vector.load %arg8[%c0_4, %c0_5] : memref<1x512xf32, #tpu.memory_space<vmem>>, vector<1x512xf32>
    %7 = vector.broadcast %6 : vector<1x512xf32> to vector<8x512xf32>
    %8 = arith.addf %5, %7 : vector<8x512xf32>
    %cst_6 = arith.constant 0.000000e+00 : f32
    %9 = vector.broadcast %cst_6 : f32 to vector<8x512xf32>
    %10 = arith.maximumf %8, %9 : vector<8x512xf32>
    %c0_7 = arith.constant 0 : index
    %c0_8 = arith.constant 0 : index
    %11 = vector.load %arg13[%c0_7, %c0_8] : memref<8x256xf32, #tpu.memory_space<vmem>>, vector<8x256xf32>
    %12 = arith.truncf %10 : vector<8x512xf32> to vector<8x512xbf16>
    %c0_9 = arith.constant 0 : index
    %c0_10 = arith.constant 0 : index
    %13 = vector.load %arg9[%c0_9, %c0_10] : memref<512x256xbf16, #tpu.memory_space<vmem>>, vector<512x256xbf16>
    %cst_11 = arith.constant dense<0.000000e+00> : vector<8x256xf32>
    %14 = tpu.matmul %12, %13, %cst_11 {dimension_numbers = #tpu.dot_dimension_numbers<[1], [0], [0], [1], [0, 0, 1, 1], [], []>} : vector<8x512xbf16>, vector<512x256xbf16>, vector<8x256xf32> -> vector<8x256xf32>
    %15 = arith.addf %11, %14 : vector<8x256xf32>
    %c0_12 = arith.constant 0 : index
    %c0_13 = arith.constant 0 : index
    %16 = vector.load %arg13[%c0_12, %c0_13] : memref<8x256xf32, #tpu.memory_space<vmem>>, vector<8x256xf32>
    tpu.vector_store %arg13[%c0_12, %c0_13], %15 {strides = array<i32>} : memref<8x256xf32, #tpu.memory_space<vmem>>, vector<8x256xf32>,
    %c7_i32 = arith.constant 7 : i32
    %17 = arith.cmpi eq, %arg1, %c7_i32 : i32
    %18 = arith.extui %17 : i1 to i32
    %c0_i32_14 = arith.constant 0 : i32
    %19 = arith.cmpi ne, %18, %c0_i32_14 : i32
    scf.if %19 {
      %c0_15 = arith.constant 0 : index
      %c0_16 = arith.constant 0 : index
      %20 = vector.load %arg13[%c0_15, %c0_16] : memref<8x256xf32, #tpu.memory_space<vmem>>, vector<8x256xf32>
      %c0_17 = arith.constant 0 : index
      %c0_18 = arith.constant 0 : index
      %21 = vector.load %arg10[%c0_17, %c0_18] : memref<1x256xf32, #tpu.memory_space<vmem>>, vector<1x256xf32>
      %22 = vector.broadcast %21 : vector<1x256xf32> to vector<8x256xf32>
      %23 = arith.addf %20, %22 : vector<8x256xf32>
      %24 = vector.extract_strided_slice %23 {offsets = [0, 0], sizes = [8, 128], strides = [1, 1]} : vector<8x256xf32> to vector<8x128xf32>
      %c0_19 = arith.constant 0 : index
      %c128 = arith.constant 128 : index
      %25 = vector.load %arg11[%c0_19, %c128] : memref<8x384xf32, #tpu.memory_space<vmem>>, vector<8x128xf32>
      tpu.vector_store %arg11[%c0_19, %c128], %24 {strides = array<i32>} : memref<8x384xf32, #tpu.memory_space<vmem>>, vector<8x128xf32>,
      %26 = vector.extract_strided_slice %23 {offsets = [0, 128], sizes = [8, 128], strides = [1, 1]} : vector<8x256xf32> to vector<8x128xf32>
      %27 = arith.mulf %26, %26 : vector<8x128xf32>
      %cst_20 = arith.constant dense<0.000000e+00> : vector<8xf32>
      %28 = vector.multi_reduction <add>, %27, %cst_20 [1] : vector<8x128xf32> to vector<8xf32>
      %29 = vector.shape_cast %28 : vector<8xf32> to vector<8x1xf32>
      %cst_21 = arith.constant 1.000000e-24 : f32
      %30 = vector.broadcast %cst_21 : f32 to vector<8x1xf32>
      %31 = arith.maximumf %29, %30 : vector<8x1xf32>
      %32 = math.rsqrt %31 : vector<8x1xf32>
      %33 = vector.broadcast %32 : vector<8x1xf32> to vector<8x128xf32>
      %34 = arith.mulf %26, %33 : vector<8x128xf32>
      %c0_22 = arith.constant 0 : index
      %c256 = arith.constant 256 : index
      %35 = vector.load %arg11[%c0_22, %c256] : memref<8x384xf32, #tpu.memory_space<vmem>>, vector<8x128xf32>
      tpu.vector_store %arg11[%c0_22, %c256], %34 {strides = array<i32>} : memref<8x384xf32, #tpu.memory_space<vmem>>, vector<8x128xf32>,
    } else {
    }
    return
  }
  func.func @transform_0(%arg0: i32, %arg1: i32) -> (i32, i32) {
    %c0_i32 = arith.constant 0 : i32
    %c0_i32_0 = arith.constant 0 : i32
    return %arg0, %c0_i32 : i32, i32
  }
  func.func @transform_1(%arg0: i32, %arg1: i32) -> (i32, i32) {
    %c0_i32 = arith.constant 0 : i32
    %c0_i32_0 = arith.constant 0 : i32
    %c0_i32_1 = arith.constant 0 : i32
    return %c0_i32, %c0_i32_0 : i32, i32
  }
  func.func @transform_2(%arg0: i32, %arg1: i32) -> (i32, i32) {
    %c0_i32 = arith.constant 0 : i32
    %c0_i32_0 = arith.constant 0 : i32
    %c0_i32_1 = arith.constant 0 : i32
    return %c0_i32, %c0_i32_0 : i32, i32
  }
  func.func @transform_3(%arg0: i32, %arg1: i32) -> (i32, i32) {
    %c0_i32 = arith.constant 0 : i32
    %c0_i32_0 = arith.constant 0 : i32
    %c0_i32_1 = arith.constant 0 : i32
    return %c0_i32, %c0_i32_0 : i32, i32
  }
  func.func @transform_4(%arg0: i32, %arg1: i32) -> (i32, i32) {
    %c0_i32 = arith.constant 0 : i32
    %c0_i32_0 = arith.constant 0 : i32
    %c0_i32_1 = arith.constant 0 : i32
    return %c0_i32, %c0_i32_0 : i32, i32
  }
  func.func @transform_5(%arg0: i32, %arg1: i32) -> (i32, i32) {
    %c0_i32 = arith.constant 0 : i32
    %c0_i32_0 = arith.constant 0 : i32
    return %c0_i32, %arg1 : i32, i32
  }
  func.func @transform_6(%arg0: i32, %arg1: i32) -> (i32, i32) {
    %c0_i32 = arith.constant 0 : i32
    %c0_i32_0 = arith.constant 0 : i32
    return %c0_i32, %arg1 : i32, i32
  }
  func.func @transform_7(%arg0: i32, %arg1: i32) -> (i32, i32) {
    %c0_i32 = arith.constant 0 : i32
    %c0_i32_0 = arith.constant 0 : i32
    return %arg1, %c0_i32 : i32, i32
  }
  func.func @transform_8(%arg0: i32, %arg1: i32) -> (i32, i32) {
    %c0_i32 = arith.constant 0 : i32
    %c0_i32_0 = arith.constant 0 : i32
    %c0_i32_1 = arith.constant 0 : i32
    return %c0_i32, %c0_i32_0 : i32, i32
  }
  func.func @transform_9(%arg0: i32, %arg1: i32) -> (i32, i32) {
    %c0_i32 = arith.constant 0 : i32
    %c0_i32_0 = arith.constant 0 : i32
    return %arg0, %c0_i32 : i32, i32
  }
}

</mosaic_0001>

<bundles_post_ra>
// kernel: multiple_task_network_forward.1
= control target key start
LH: loop header
LB: loop body
LE: loop exit
PB: predicated region body
PF: predicated region fallthrough
CT: control target
= control target key end

     0   :  { %s3840_s0 = inlined_call_operand.vmem [shape: bf16[8,1024], index: 0, kind: input, shape index: {}]   ;;  %s3841_s1 = inlined_call_operand.hbm [shape: bf16[1024,128], index: 1, kind: input, shape index: {}]   ;;  %s3842_s2 = inlined_call_operand.hbm [shape: f32[1,128], index: 2, kind: input, shape index: {}]   ;;  %s3843_s3 = inlined_call_operand.hbm [shape: bf16[128,128], index: 3, kind: input, shape index: {}]   ;;  %s3844_s4 = inlined_call_operand.hbm [shape: f32[1,128], index: 4, kind: input, shape index: {}]   ;;  %s3845_s5 = inlined_call_operand.hbm [shape: bf16[128,4096], index: 5, kind: input, shape index: {}]   ;;  %s3846_s6 = inlined_call_operand.hbm [shape: f32[1,4096], index: 6, kind: input, shape index: {}]   ;;  %s3847_s7 = inlined_call_operand.hbm [shape: bf16[4096,256], index: 7, kind: input, shape index: {}]   ;;  %s3848_s8 = inlined_call_operand.hbm [shape: f32[1,256], index: 8, kind: input, shape index: {}]   ;;  %s3849_s9 = inlined_call_operand.vmem [shape: f32[8,384], index: 9, kind: output, shape index: {}]  }
   0x1   :  { %3871 = sst [smem:[#allocation26_spill]] %s3840_s0 }
   0x2   :  { %3872 = sst [smem:[#allocation27_spill]] %s3841_s1 }
   0x3   :  { %3873 = sst [smem:[#allocation28_spill]] %s3842_s2 }
   0x4   :  { %3874 = sst [smem:[#allocation29_spill]] %s3845_s5 }
   0x5   :  { %3875 = sst [smem:[#allocation30_spill]] %s3849_s9 }
   0x6   :  { %14 = vsyncpa [#allocation5], 0 }
   0x7   :  { %15 = vsyncpa [#allocation7], 0 }
   0x8   :  { %16 = vsyncpa [#allocation10], 0  ;;  %s3387_s30 = smov 0   ;;  %s3389_s10 = smov 0  }
   0x9   :  { %s3391_s11 = smov 0   ;;  %s3393_s12 = smov 0  }
   0xa   :  { %s3395_s13 = smov 0   ;;  %s3397_s14 = smov 0  }
   0xb LB: > { %3876 = sst [smem:[#allocation20_spill]] %s3301_s10  ;;  %s3854_s15 = sadd.s32 4294967295, %s3317_s14   ;;  %s3317_s14 = sphi %s3397_s14, %s22_s14   ;;  %s3313_s13 = sphi %s3395_s13, %s3917_s13   ;;  %s3309_s12 = sphi %s3393_s12, %s3916_s12   ;;  %s3305_s11 = sphi %s3391_s11, %s3914_s11   ;;  %s3301_s10 = sphi %s3389_s10, %s3913_s10   ;;  %s3297_s30 = sphi %s3387_s30, %s3912_s30  }
   0xc   : > { %3877 = sst [smem:[#allocation21_spill]] %s3305_s11  ;;  %p164_p0 = scmp.ne.s32.totalorder %s3301_s10, %s3297_s30 }
   0xd   : > { %3878 = sst [smem:[#allocation22_spill]] %s3309_s12  ;;  %p3419_p1 = scmp.eq.s32.totalorder %s3854_s15, 0 }
   0xe   : > { %p2338_p2 = scmp.ge.s32.totalorder %s3317_s14, 1  ;;  %p274_p3 = scmp.lt.s32.totalorder %s3317_s14, 9 }
   0xf   : > { %s3879_s16 = scalar_select %p3419_p1, 1, 0 }
  0x10   : > { %p3427_p4 = por %p3419_p1, %p164_p0  ;;  %p3431_p5 = pnand %p2338_p2, %p274_p3 }
  0x11   : > { %s3319_s19 = smov [#allocation4]   ;;  %s3320_s22 = smov [#allocation6]  }
  0x12   : > { %s3880_s17 = scalar_select %p3427_p4, 1, 0 }
  0x13   : > { %s3882_s18 = scalar_select %p3431_p5, 1, 0 }
  0x14   : > { %3881 = sst [smem:[#allocation23_spill]] %s3880_s17  ;;  %s294_s20 = sshll.u32 %s3319_s19, 4  ;;  %s295_s20 = int_to_ptr.vmem [resolvable:$true] %s294_s20 }
  0x15   : > { %p2695_p6 = pneg %p3431_p5  ;;  %s308_s23 = sshll.u32 %s3320_s22, 4  ;;  %s3443_s23 = int_to_ptr.vmem [resolvable:$true] %s308_s23 }
  0x16   : > { %s3884_s1 = sld [smem:[#allocation27_spill]] }
  0x17   : > { %p3439_p7 = pnand %p2695_p6, %p3419_p1 }
  0x19   : > { %s3883_s21 = scalar_select %p3439_p7, 1, 0 }
  0x1a   : > { %p3453_p9 = pneg %p3439_p7 }
  0x1c   : > { %s3021_s26 = scalar_lea.hbm %s3884_s1, 8192 }
  0x1d   : > { %p3022_p8 = scmp.ne.s32.totalorder %s3884_s1, %s3021_s26  ;;  %p3028_p12 = scmp.lt.u32.totalorder %s3021_s26, %s3884_s1 }
  0x1e   : > { %s3885_s29 = scalar_select %p3453_p9, 1, 0 }
  0x1f   : > { %p3024_p10 = pnand %p3453_p9, %p3022_p8 }
  0x21   : > { %p3025_p11 = pneg %p3024_p10 }
  0x23   : > { %p3030_p13 = pnand %p3028_p12, %p3025_p11 }
  0x25   : > { %3033 = shalt.err (!%p3030_p13)
}
  0x26   : > { %s3034_s22 = scalar_lea.vmem %s295_s20, 8192  ;;  %p3042_p6 = scmp.lt.s32.totalorder %s295_s20, %s295_s20 }
  0x27   : > { %p3035_p0 = scmp.ne.s32.totalorder %s295_s20, %s3034_s22  ;;  %p3043_p4 = scmp.lt.s32.totalorder %s3034_s22, %s3034_s22 }
  0x29   : > { %p3037_p2 = pnand %p3035_p0, %p3453_p9  ;;  %p3044_p1 = por %p3043_p4, %p3042_p6 }
  0x2b   : > { %p3038_p3 = pneg %p3037_p2 }
  0x2d   : > { %p3045_p5 = pnand %p3044_p1, %p3038_p3 }
  0x2f   : > { %3048 = shalt.err (!%p3045_p5)
}
  0x30   : > { %s3857_s24 = smov 64   ;;  %s3858_s25 = smov 4  }
  0x31   : > { %2698 = dma.hbm_to_vmem [thread:$0]  (!%p3439_p7), %s3884_s1, 8192, %s295_s20, [#allocation5], %s3857_s24, %s3857_s24, %s3858_s25  }
  0x32   : > { %s3886_s2 = sld [smem:[#allocation28_spill]] }
  0x38   : > { %s3049_s19 = scalar_lea.hbm %s3886_s2, 16 }
  0x39   : > { %p3050_p1 = scmp.ne.s32.totalorder %s3886_s2, %s3049_s19  ;;  %p3056_p8 = scmp.lt.u32.totalorder %s3049_s19, %s3886_s2 }
  0x3b   : > { %p3052_p4 = pnand %p3050_p1, %p3453_p9 }
  0x3d   : > { %p3053_p5 = pneg %p3052_p4 }
  0x3f   : > { %p3058_p10 = pnand %p3056_p8, %p3053_p5 }
  0x41   : > { %3061 = shalt.err (!%p3058_p10)
}
  0x42   : > { %s3062_s20 = scalar_lea.vmem %s3443_s23, 16  ;;  %s3069_s15 = scalar_lea.vmem %s3443_s23, 32 }
  0x43   : > { %p3063_p11 = scmp.ne.s32.totalorder %s3443_s23, %s3062_s20  ;;  %p3070_p0 = scmp.lt.s32.totalorder %s3443_s23, %s3443_s23 }
  0x44   : > { %p3071_p2 = scmp.lt.s32.totalorder %s3069_s15, %s3062_s20 }
  0x45   : > { %p3065_p12 = pnand %p3063_p11, %p3453_p9 }
  0x46   : > { %p3072_p3 = por %p3071_p2, %p3070_p0 }
  0x47   : > { %p3066_p13 = pneg %p3065_p12 }
  0x49   : > { %p3073_p6 = pnand %p3072_p3, %p3066_p13 }
  0x4b   : > { %3076 = shalt.err (!%p3073_p6)
}
  0x4c   : > { %2701 = dma.hbm_to_vmem [thread:$0]  (!%p3439_p7), %s3886_s2, 16, %s3443_s23, [#allocation7]  }
  0x4d   : > { %s31_s26 = sadd.s32 1, %s3313_s13  ;;  %s151_s27 = sadd.s32 1, %s3305_s11 }
  0x4e   : > { %p32_p1 = scmp.ge.s32.totalorder %s31_s26, 8  ;;  %p158_p4 = scmp.ne.s32.totalorder %s3305_s11, %s3301_s10 }
  0x4f   : > { %p159_p5 = scmp.eq.s32.totalorder %s3317_s14, 0  ;;  %p2726_p8 = scmp.lt.s32.totalorder %s3317_s14, 8 }
  0x50   : > { %s3919_s26 = smov (%p32_p1, %s31_s26), 0  ;;  %s354_s28 = sand.u32 1, %s3317_s14  }
  0x51   : > { %3887 = sst [smem:[#allocation24_spill]] %s3919_s26  ;;  %p160_p10 = por %p159_p5, %p158_p4 }
  0x52   : > { %s148_s30 = ssub.s32 %s3313_s13, %s3919_s26  ;;  %s3508_s19 = sand.u32 1, %s3305_s11  }
  0x53   : > { %p149_p11 = scmp.eq.s32.totalorder %s148_s30, 0  ;;  %s2346_s22 = sshll.u32 %s3508_s19, 8 }
  0x54   : > { %s2548_s20 = sshll.u32 %s3313_s13, 8  ;;  %s3889_s5 = sld [smem:[#allocation29_spill]] }
  0x55   : > { %s3513_s23 = scalar_select %p149_p11, %s3305_s11, %s151_s27  }
  0x56   : > { %s358_s24 = scalar_lea.vmem [#allocation11], %s2346_s22  ;;  %p3522_p12 = pnand %p2726_p8, %p160_p10 }
  0x57   : > { %3888 = sst [smem:[#allocation25_spill]] %s3513_s23  ;;  %s365_s25 = sshll.u32 %s358_s24, 4  ;;  %s3526_s25 = int_to_ptr.vmem [resolvable:$true] %s365_s25 }
  0x58   : > { %s3890_s30 = scalar_select %p3522_p12, 1, 0 }
  0x59   : > { %s3528_s27 = scalar_lea.sflag [#allocation5], %s354_s28  ;;  %p3534_p0 = pneg %p3522_p12 }
  0x5a   : > { %s3518_s9 = scalar_lea.hbm %s3889_s5, %s2548_s20  ;;  %s3082_s15 = scalar_lea.hbm %s3889_s5, 32768 }
  0x5b   : > { %s3077_s1 = scalar_lea.hbm %s3518_s9, 4096  ;;  %p3083_p6 = scmp.lt.u32.totalorder %s3518_s9, %s3889_s5 }
  0x5c   : > { %p3078_p13 = scmp.ne.s32.totalorder %s3518_s9, %s3077_s1  ;;  %p3084_p1 = scmp.lt.u32.totalorder %s3082_s15, %s3077_s1 }
  0x5d   : > { %p3086_p5 = scmp.lt.u32.totalorder %s3077_s1, %s3518_s9 }
  0x5e   : > { %p3080_p2 = pnand %p3534_p0, %p3078_p13  ;;  %p3085_p4 = por %p3084_p1, %p3083_p6 }
  0x60   : > { %p3081_p3 = pneg %p3080_p2  ;;  %p3087_p8 = por %p3086_p5, %p3085_p4 }
  0x62   : > { %p3088_p10 = pnand %p3087_p8, %p3081_p3 }
  0x64   : > { %3091 = shalt.err (!%p3088_p10)
}
  0x65   : > { %s3092_s28 = scalar_lea.vmem %s3526_s25, 4096  ;;  %s3323_s24 = smov [#allocation11]  }
  0x66   : > { %p3093_p11 = scmp.ne.s32.totalorder %s3526_s25, %s3092_s28  ;;  %s3097_s22 = sshll.u32 %s3323_s24, 4  ;;  %s3098_s22 = int_to_ptr.vmem [resolvable:$false] %s3097_s22 }
  0x67   : > { %s3099_s2 = scalar_lea.vmem %s3098_s22, 8192  ;;  %p3100_p7 = scmp.lt.s32.totalorder %s3526_s25, %s3098_s22 }
  0x68   : > { %p3095_p13 = pnand %p3093_p11, %p3534_p0  ;;  %p3101_p9 = scmp.lt.s32.totalorder %s3099_s2, %s3092_s28 }
  0x6a   : > { %p3096_p2 = pneg %p3095_p13  ;;  %p3102_p6 = por %p3101_p9, %p3100_p7 }
  0x6c   : > { %p3103_p1 = pnand %p3102_p6, %p3096_p2 }
  0x6e   : > { %3106 = shalt.err (!%p3103_p1)
}
  0x6f   : > { %s3324_s1 = smov 2048   ;;  %s3325_s15 = smov 256  }
  0x70   : > { %s3326_s0 = smov 16   ;;  %s3327_s5 = smov [#allocation8]  }
  0x71   : > { %2714 = dma.hbm_to_vmem [thread:$0]  (!%p3522_p12), %s3518_s9, 4096, %s3526_s25, %s3528_s27, %s3324_s1, %s3325_s15, %s3326_s0  }
  0x72   : > { %s318_s24 = sshll.u32 %s3327_s5, 4  ;;  %s2349_s26 = sshll.u32 %s3508_s19, 2  ;;  %s319_s24 = int_to_ptr.vmem [resolvable:$true] %s318_s24 }
  0x73   : > { %s3107_s2 = scalar_lea.hbm %s3843_s3, 1024  ;;  %p3892_p9 = scmp.ne.s32.totalorder %s3885_s29, 0 }
  0x74   : > { %p3108_p7 = scmp.ne.s32.totalorder %s3843_s3, %s3107_s2  ;;  %p3114_p5 = scmp.lt.u32.totalorder %s3107_s2, %s3843_s3 }
  0x76   : > { %p3110_p3 = pnand %p3108_p7, %p3892_p9 }
  0x78   : > { %p3111_p4 = pneg %p3110_p3 }
  0x7a   : > { %p3116_p8 = pnand %p3114_p5, %p3111_p4 }
  0x7c   : > { %3119 = shalt.err (!%p3116_p8)
}
  0x7d   : > { %s3120_s5 = scalar_lea.vmem %s319_s24, 1024  ;;  %p3128_p2 = scmp.lt.s32.totalorder %s319_s24, %s319_s24 }
  0x7e   : > { %p3121_p10 = scmp.ne.s32.totalorder %s319_s24, %s3120_s5  ;;  %p3129_p6 = scmp.lt.s32.totalorder %s3120_s5, %s3120_s5 }
  0x80   : > { %p3123_p11 = pnand %p3121_p10, %p3892_p9  ;;  %p3130_p1 = por %p3129_p6, %p3128_p2 }
  0x82   : > { %p3124_p13 = pneg %p3123_p11 }
  0x84   : > { %p3131_p12 = pnand %p3130_p1, %p3124_p13 }
  0x86   : > { %3134 = shalt.err (!%p3131_p12)
}
  0x87   : > { %p3893_p7 = scmp.ne.s32.totalorder %s3883_s21, 0  ;;  %s3894_s11 = smov 4  }
  0x88   : > { %s3895_s25 = smov 64   ;;  %s2549_s23 = sshll.u32 %s3313_s13, 6 }
  0x89   : > { %2704 = dma.hbm_to_vmem [thread:$0]  (!%p3893_p7), %s3843_s3, 1024, %s319_s24, [#allocation7], %s3895_s25, %s3895_s25, %s3894_s11  }
  0x8a   : > { %s379_s9 = scalar_lea.vmem [#allocation12], %s2349_s26  ;;  %s385_s22 = scalar_lea.hbm %s3846_s6, %s2549_s23 }
  0x8b   : > { %s387_s1 = sshll.u32 %s379_s9, 4  ;;  %s3135_s28 = scalar_lea.hbm %s385_s22, 64  ;;  %s388_s1 = int_to_ptr.vmem [resolvable:$true] %s387_s1 }
  0x8c   : > { %p3136_p12 = scmp.ne.s32.totalorder %s385_s22, %s3135_s28  ;;  %s3140_s12 = scalar_lea.hbm %s3846_s6, 512 }
  0x8d   : > { %p3141_p5 = scmp.lt.u32.totalorder %s385_s22, %s3846_s6  ;;  %p3142_p8 = scmp.lt.u32.totalorder %s3140_s12, %s3135_s28 }
  0x8e   : > { %p3138_p3 = pnand %p3136_p12, %p3534_p0  ;;  %p3144_p11 = scmp.lt.u32.totalorder %s3135_s28, %s385_s22 }
  0x8f   : > { %p3143_p10 = por %p3142_p8, %p3141_p5 }
  0x90   : > { %p3139_p4 = pneg %p3138_p3 }
  0x91   : > { %p3145_p13 = por %p3144_p11, %p3143_p10 }
  0x93   : > { %p3146_p2 = pnand %p3145_p13, %p3139_p4 }
  0x95   : > { %3149 = shalt.err (!%p3146_p2)
}
  0x96   : > { %s3150_s26 = scalar_lea.vmem %s388_s1, 64  ;;  %s3328_s24 = smov [#allocation12]  }
  0x97   : > { %p3151_p6 = scmp.ne.s32.totalorder %s388_s1, %s3150_s26  ;;  %s3155_s11 = sshll.u32 %s3328_s24, 4  ;;  %s3156_s11 = int_to_ptr.vmem [resolvable:$false] %s3155_s11 }
  0x98   : > { %s3157_s25 = scalar_lea.vmem %s3156_s11, 128  ;;  %p3158_p3 = scmp.lt.s32.totalorder %s388_s1, %s3156_s11 }
  0x99   : > { %p3153_p1 = pnand %p3151_p6, %p3534_p0  ;;  %p3159_p7 = scmp.lt.s32.totalorder %s3157_s25, %s3150_s26 }
  0x9b   : > { %p3154_p12 = pneg %p3153_p1  ;;  %p3160_p9 = por %p3159_p7, %p3158_p3 }
  0x9d   : > { %p3161_p5 = pnand %p3160_p9, %p3154_p12 }
  0x9f   : > { %3164 = shalt.err (!%p3161_p5)
}
  0xa0   : > { %p3896_p8 = scmp.ne.s32.totalorder %s3890_s30, 0  ;;  %s3329_s10 = smov [#allocation9]  }
  0xa1   : > { %s332_s23 = sshll.u32 %s3329_s10, 4  ;;  %s3330_s9 = smov [#allocation14]   ;;  %s333_s23 = int_to_ptr.vmem [resolvable:$true] %s332_s23 }
  0xa2   : > { %2717 = dma.hbm_to_vmem [thread:$0]  (!%p3896_p8), %s385_s22, 64, %s388_s1, %s3528_s27  }
  0xa3   : > { %s343_s15 = sshll.u32 %s3330_s9, 4  ;;  %s3165_s2 = scalar_lea.hbm %s3844_s4, 16  ;;  %s3597_s15 = int_to_ptr.vmem [resolvable:$true] %s343_s15 }
  0xa4   : > { %p3166_p9 = scmp.ne.s32.totalorder %s3844_s4, %s3165_s2  ;;  %p3897_p7 = scmp.ne.s32.totalorder %s3885_s29, 0 }
  0xa5   : > { %p3172_p11 = scmp.lt.u32.totalorder %s3165_s2, %s3844_s4 }
  0xa6   : > { %p3168_p4 = pnand %p3166_p9, %p3897_p7 }
  0xa8   : > { %p3169_p10 = pneg %p3168_p4 }
  0xaa   : > { %p3174_p13 = pnand %p3172_p11, %p3169_p10 }
  0xac   : > { %3177 = shalt.err (!%p3174_p13)
}
  0xad   : > { %s3178_s22 = scalar_lea.vmem %s333_s23, 16  ;;  %s3185_s26 = scalar_lea.vmem %s333_s23, 32 }
  0xae   : > { %p3179_p2 = scmp.ne.s32.totalorder %s333_s23, %s3178_s22  ;;  %p3186_p12 = scmp.lt.s32.totalorder %s333_s23, %s333_s23 }
  0xaf   : > { %p3187_p3 = scmp.lt.s32.totalorder %s3185_s26, %s3178_s22 }
  0xb0   : > { %p3181_p6 = pnand %p3179_p2, %p3897_p7 }
  0xb1   : > { %p3188_p5 = por %p3187_p3, %p3186_p12 }
  0xb2   : > { %p3182_p1 = pneg %p3181_p6 }
  0xb4   : > { %p3189_p8 = pnand %p3188_p5, %p3182_p1 }
  0xb6   : > { %3192 = shalt.err (!%p3189_p8)
}
  0xb7   : > { %p3898_p9 = scmp.ne.s32.totalorder %s3883_s21, 0  ;;  %s3193_s9 = scalar_lea.hbm %s3848_s8, 32 }
  0xb8   : > { %p3194_p4 = scmp.ne.s32.totalorder %s3848_s8, %s3193_s9  ;;  %p3200_p8 = scmp.lt.u32.totalorder %s3193_s9, %s3848_s8 }
  0xb9   : > { %2707 = dma.hbm_to_vmem [thread:$0]  (!%p3898_p9), %s3844_s4, 16, %s333_s23, [#allocation10]  }
  0xba   : > { %p3196_p10 = pnand %p3194_p4, %p3897_p7 }
  0xbc   : > { %p3197_p11 = pneg %p3196_p10 }
  0xbe   : > { %p3202_p13 = pnand %p3200_p8, %p3197_p11 }
  0xc0   : > { %3205 = shalt.err (!%p3202_p13)
}
  0xc1   : > { %s3206_s23 = scalar_lea.vmem %s3597_s15, 32  ;;  %p3214_p12 = scmp.lt.s32.totalorder %s3597_s15, %s3597_s15 }
  0xc2   : > { %p3207_p2 = scmp.ne.s32.totalorder %s3597_s15, %s3206_s23  ;;  %p3215_p3 = scmp.lt.s32.totalorder %s3206_s23, %s3206_s23 }
  0xc4   : > { %p3209_p6 = pnand %p3207_p2, %p3897_p7  ;;  %p3216_p5 = por %p3215_p3, %p3214_p12 }
  0xc6   : > { %p3210_p1 = pneg %p3209_p6 }
  0xc8   : > { %p3217_p4 = pnand %p3216_p5, %p3210_p1 }
  0xca   : > { %3220 = shalt.err (!%p3217_p4)
}
  0xcb   : > { %2710 = dma.hbm_to_vmem [thread:$0]  (!%p3898_p9), %s3848_s8, 32, %s3597_s15, [#allocation7]  }
  0xcc   : > { %s2352_s1 = sshll.u32 %s3508_s19, 9  ;;  %s2551_s29 = sshll.u32 %s3313_s13, 13 }
  0xcd   : > { %s3645_s24 = scalar_lea.hbm %s3847_s7, %s2551_s29  ;;  %s398_s21 = scalar_lea.vmem [#allocation13], %s2352_s1 }
  0xce   : > { %s406_s11 = sshll.u32 %s398_s21, 4  ;;  %s3221_s25 = scalar_lea.hbm %s3645_s24, 8192  ;;  %s3647_s11 = int_to_ptr.vmem [resolvable:$true] %s406_s11 }
  0xcf   : > { %p3222_p7 = scmp.ne.s32.totalorder %s3645_s24, %s3221_s25  ;;  %s3226_s10 = scalar_lea.hbm %s3847_s7, 65536 }
  0xd0   : > { %p3227_p11 = scmp.lt.u32.totalorder %s3645_s24, %s3847_s7  ;;  %p3228_p8 = scmp.lt.u32.totalorder %s3226_s10, %s3221_s25 }
  0xd1   : > { %p3224_p10 = pnand %p3222_p7, %p3534_p0  ;;  %p3230_p2 = scmp.lt.u32.totalorder %s3221_s25, %s3645_s24 }
  0xd2   : > { %p3229_p13 = por %p3228_p8, %p3227_p11 }
  0xd3   : > { %p3225_p9 = pneg %p3224_p10 }
  0xd4   : > { %p3231_p6 = por %p3230_p2, %p3229_p13 }
  0xd6   : > { %p3232_p1 = pnand %p3231_p6, %p3225_p9 }
  0xd8   : > { %3235 = shalt.err (!%p3232_p1)
}
  0xd9   : > { %s3236_s28 = scalar_lea.vmem %s3647_s11, 8192  ;;  %s3331_s2 = smov [#allocation13]  }
  0xda   : > { %p3237_p12 = scmp.ne.s32.totalorder %s3647_s11, %s3236_s28  ;;  %s3241_s5 = sshll.u32 %s3331_s2, 4  ;;  %s3242_s5 = int_to_ptr.vmem [resolvable:$false] %s3241_s5 }
  0xdb   : > { %s3243_s23 = scalar_lea.vmem %s3242_s5, 16384  ;;  %p3244_p4 = scmp.lt.s32.totalorder %s3647_s11, %s3242_s5 }
  0xdc   : > { %p3239_p3 = pnand %p3237_p12, %p3534_p0  ;;  %p3245_p7 = scmp.lt.s32.totalorder %s3243_s23, %s3236_s28 }
  0xde   : > { %p3240_p5 = pneg %p3239_p3  ;;  %p3246_p10 = por %p3245_p7, %p3244_p4 }
  0xe0   : > { %p3247_p11 = pnand %p3246_p10, %p3240_p5 }
  0xe2   : > { %3250 = shalt.err (!%p3247_p11)
}
  0xe3   : > { %s3332_s12 = smov 128   ;;  %s3333_s17 = smov 8  }
  0xe4   : > { %p3899_p9 = scmp.ne.s32.totalorder %s3890_s30, 0  ;;  %p3900_p0 = scmp.ne.s32.totalorder %s3882_s18, 0 }
  0xe5   : > { %p3901_p8 = scmp.ne.s32.totalorder (!%p3900_p0), %s3879_s16, 0 }
  0xe6   : > { %2720 = dma.hbm_to_vmem [thread:$0]  (!%p3899_p9), %s3645_s24, 8192, %s3647_s11, %s3528_s27, %s3332_s12, %s3332_s12, %s3333_s17  }
  0xe7   : > { %418 = sbr.rel (%p3900_p0) target bundleno = 1408 (0x580), region = 56 }
  0xee   : > { %3276 = dma.done.wait (%p3901_p8), [#allocation5], 8192  }
  0xef   : > { %3278 = vsyncadd (%p3901_p8), [#allocation5], 4294959104 }
  0xf0   : > { %3280 = dma.done.wait (%p3901_p8), [#allocation7], 1040  }
  0xf1   : > { %3282 = vsyncadd (%p3901_p8), [#allocation7], 4294966256 }
  0xf2   : > { %3284 = dma.done.wait (%p3901_p8), [#allocation10], 16  }
  0xf3   : > { %3286 = vsyncadd (%p3901_p8), [#allocation10], 4294967280  ;;  %s3902_s18 = sadd.s32 4294967295, %s3317_s14   ;;  %s3903_s30 = sld [smem:[#allocation20_spill]] }
  0xf4   : > { %s3904_s27 = sld [smem:[#allocation23_spill]]  ;;  %s436_s20 = sand.u32 1, %s3902_s18  }
  0xf5   : > { %s437_s22 = scalar_lea.sflag [#allocation5], %s436_s20 }
  0xf9   : > { %s438_s1 = sand.u32 1, %s3903_s30  }
  0xfa   : > { %s2361_s29 = sshll.u32 %s438_s1, 8  ;;  %p3905_p13 = scmp.ne.s32.totalorder %s3904_s27, 0 }
  0xfb   : > { %s3688_s26 = scalar_lea.vmem [#allocation11], %s2361_s29 }
  0xfc   : > { %3288 = dma.done.wait (%p3905_p13), %s437_s22, 12352  }
  0xfd   : > { %3290 = vsyncadd (%p3905_p13), %s437_s22, 4294954944  ;;  %s2362_s24 = sshll.u32 %s438_s1, 2  ;;  %s2363_s21 = sshll.u32 %s438_s1, 9 }
  0xfe   : > { %s3694_s11 = scalar_lea.vmem [#allocation12], %s2362_s24  ;;  %s3696_s25 = scalar_lea.vmem [#allocation13], %s2363_s21 }
  0xff   : > { %3292 = dma.done.wait (%p3901_p8), [#allocation7], 32  }
 0x100   : > { %3294 = vsyncadd (%p3901_p8), [#allocation7], 4294967264  ;;  %s3906_s19 = sld [smem:[#allocation22_spill]] }
 0x106   : > { %p2365_p2 = scmp.ne.s32.totalorder %s3906_s19, 0 }
 0x107   : > { %v2795_v0 = vld [vmem:[#allocation4 + $0x40] sm:$0xff] (!%p2365_p2)   ;;  %v2799_v4 = vld [vmem:[#allocation4 + $0x48] sm:$0xff] (!%p2365_p2)   ;;  %v2803_v8 = vld [vmem:[#allocation4 + $0x50] sm:$0xff] (!%p2365_p2)   ;;  %s3907_s10 = sld [smem:[#allocation26_spill]] (!%p2365_p2)  ;;  %vm3335_vm0 = vmmov (!%p2365_p2), 0   ;;  %s3909_s30 = sld [smem:[#allocation30_spill]] (!%p2365_p2) }
 0x108   : > { %529 = sbr.rel (%p2365_p2) target bundleno = 767 (0x2ff), region = 92  ;;  %v2796_v1 = vld [vmem:[#allocation4 + $0xc0] sm:$0xff] (!%p2365_p2)   ;;  %2552 = vmatprep.subr.bf16.mxu0 (!%p2365_p2), %v2795_v0  ;;  %v2800_v5 = vld [vmem:[#allocation4 + $0xc8] sm:$0xff] (!%p2365_p2)   ;;  %v2804_v9 = vld [vmem:[#allocation4 + $0xd0] sm:$0xff] (!%p2365_p2)  }
 0x109   : > { %v2797_v2 = vld [vmem:[#allocation4] sm:$0xff] (!%p2365_p2)   ;;  %2574 = vmatprep.subr.bf16.mxu1 (!%p2365_p2), %v2796_v1  ;;  %v2801_v6 = vld [vmem:[#allocation4 + $0x8] sm:$0xff] (!%p2365_p2)   ;;  %v2805_v10 = vld [vmem:[#allocation4 + $0x10] sm:$0xff] (!%p2365_p2)  }
 0x10a   : > { %v2798_v3 = vld [vmem:[#allocation4 + $0x80] sm:$0xff] (!%p2365_p2)   ;;  %2553 = vmatpush3.bf16.msra.mxu0 (!%p2365_p2), %v2797_v2  ;;  %v2802_v7 = vld [vmem:[#allocation4 + $0x88] sm:$0xff] (!%p2365_p2)   ;;  %v2806_v11 = vld [vmem:[#allocation4 + $0x90] sm:$0xff] (!%p2365_p2)  }
 0x10b   : > { %2575 = vmatpush3.bf16.msra.mxu1 (!%p2365_p2), %v2798_v3  ;;  %2554 = vmatprep.subr.bf16.mxu0 (!%p2365_p2), %v2799_v4  ;;  %v2807_v12 = vld [vmem:[#allocation4 + $0x58] sm:$0xff] (!%p2365_p2)   ;;  %v2811_v16 = vld [vmem:[#allocation4 + $0x60] sm:$0xff] (!%p2365_p2)   ;;  %v2815_v20 = vld [vmem:[#allocation4 + $0x68] sm:$0xff] (!%p2365_p2)  }
 0x10c   : > { %2576 = vmatprep.subr.bf16.mxu1 (!%p2365_p2), %v2800_v5  ;;  %v2808_v13 = vld [vmem:[#allocation4 + $0xd8] sm:$0xff] (!%p2365_p2)   ;;  %v2812_v17 = vld [vmem:[#allocation4 + $0xe0] sm:$0xff] (!%p2365_p2)   ;;  %v2816_v21 = vld [vmem:[#allocation4 + $0xe8] sm:$0xff] (!%p2365_p2)  }
 0x10d   : > { %v2809_v14 = vld [vmem:[#allocation4 + $0x18] sm:$0xff] (!%p2365_p2)   ;;  %v2813_v18 = vld [vmem:[#allocation4 + $0x20] sm:$0xff] (!%p2365_p2)   ;;  %v2817_v22 = vld [vmem:[#allocation4 + $0x28] sm:$0xff] (!%p2365_p2)   ;;  %s3908_s9 = smov (!%p2365_p2), %s3907_s10 }
 0x10e   : > { %2555 = vmatpush3.bf16.msra.mxu0 (!%p2365_p2), %v2801_v6  ;;  %v2810_v15 = vld [vmem:[#allocation4 + $0x98] sm:$0xff] (!%p2365_p2)   ;;  %v2814_v19 = vld [vmem:[#allocation4 + $0xa0] sm:$0xff] (!%p2365_p2)   ;;  %v2818_v23 = vld [vmem:[#allocation4 + $0xa8] sm:$0xff] (!%p2365_p2)  }
 0x10f   : > { %2577 = vmatpush3.bf16.msra.mxu1 %v2802_v7  ;;  %2556 = vmatprep.subr.bf16.mxu0 %v2803_v8  ;;  %v2819_v24 = vld [vmem:[#allocation4 + $0x70] sm:$0xff]   ;;  %v2823_v28 = vld [vmem:[#allocation4 + $0x78] sm:$0xff]   ;;  %v2831_v38 = vld [vmem:[#allocation4 + $0x140] sm:$0xff]  }
 0x110   : > { %2578 = vmatprep.subr.bf16.mxu1 %v2804_v9  ;;  %v2820_v25 = vld [vmem:[#allocation4 + $0xf0] sm:$0xff]   ;;  %v2824_v29 = vld [vmem:[#allocation4 + $0xf8] sm:$0xff]   ;;  %v2832_v39 = vld [vmem:[#allocation4 + $0x1c0] sm:$0xff]  }
 0x111   : > { %v2821_v26 = vld [vmem:[#allocation4 + $0x30] sm:$0xff]   ;;  %v2825_v30 = vld [vmem:[#allocation4 + $0x38] sm:$0xff]   ;;  %v2833_v40 = vld [vmem:[#allocation4 + $0x100] sm:$0xff]  }
 0x112   : > { %2557 = vmatpush3.bf16.msra.mxu0 %v2805_v10  ;;  %v2822_v27 = vld [vmem:[#allocation4 + $0xb0] sm:$0xff]   ;;  %v2826_v31 = vld [vmem:[#allocation4 + $0xb8] sm:$0xff]   ;;  %v2834_v41 = vld [vmem:[#allocation4 + $0x180] sm:$0xff]  }
 0x113   : > { %2579 = vmatpush3.bf16.msra.mxu1 %v2806_v11  ;;  %2558 = vmatprep.subr.bf16.mxu0 %v2807_v12  ;;  %v530_v32 = vld [vmem:[%s3907_s10] sm:$0xff]  ;;  %v531_v33 = vld [vmem:[%s3908_s9 + $0x8] sm:$0xff]  ;;  %v2847_v54 = vld [vmem:[#allocation4 + $0x160] sm:$0xff]  }
 0x114   : > { %2580 = vmatprep.subr.bf16.mxu1 %v2808_v13  ;;  %v2367_v34 = vcombine.low %v530_v32, %v530_v32  ;;  %v2368_v35 = vcombine.high %v530_v32, %v530_v32  ;;  %v2369_v36 = vcombine.low %v531_v33, %v531_v33  ;;  %v2370_v37 = vcombine.high %v531_v33, %v531_v33  ;;  %v2835_v42 = vld [vmem:[#allocation4 + $0x148] sm:$0xff]   ;;  %v2839_v46 = vld [vmem:[#allocation4 + $0x150] sm:$0xff]   ;;  %v2843_v50 = vld [vmem:[#allocation4 + $0x158] sm:$0xff]  }
 0x115   : > { %v2836_v43 = vld [vmem:[#allocation4 + $0x1c8] sm:$0xff]   ;;  %v2840_v47 = vld [vmem:[#allocation4 + $0x1d0] sm:$0xff]   ;;  %v2844_v51 = vld [vmem:[#allocation4 + $0x1d8] sm:$0xff]   ;;  %v3334_v13 = vmov 0.0  }
 0x116   : > { %2559 = vmatpush3.bf16.msra.mxu0 %v2809_v14  ;;  %1113 = vmatprep.mubr.bf16.mxu0 %v2368_v35  ;;  %v2837_v44 = vld [vmem:[#allocation4 + $0x108] sm:$0xff]   ;;  %v2841_v48 = vld [vmem:[#allocation4 + $0x110] sm:$0xff]   ;;  %v2845_v52 = vld [vmem:[#allocation4 + $0x118] sm:$0xff]   ;;  %1356 = vst [vmem:[#allocation3] sm:$0xff] %v3334_v13 }
 0x117   : > { %2581 = vmatpush3.bf16.msra.mxu1 %v2810_v15  ;;  %2560 = vmatprep.subr.bf16.mxu0 %v2811_v16  ;;  %v2838_v45 = vld [vmem:[#allocation4 + $0x188] sm:$0xff]   ;;  %v2842_v49 = vld [vmem:[#allocation4 + $0x190] sm:$0xff]   ;;  %v2846_v53 = vld [vmem:[#allocation4 + $0x198] sm:$0xff]   ;;  %1357 = vst [vmem:[#allocation3 + $0x8] sm:$0xff] %v3334_v13 }
 0x118   : > { %2582 = vmatprep.subr.bf16.mxu1 %v2812_v17  ;;  %1153 = vmatprep.mubr.bf16.mxu1 %v2370_v37  ;;  %v2848_v55 = vld [vmem:[#allocation4 + $0x1e0] sm:$0xff]   ;;  %v2851_v58 = vld [vmem:[#allocation4 + $0x168] sm:$0xff]   ;;  %v2855_v62 = vld [vmem:[#allocation4 + $0x170] sm:$0xff]  }
 0x119   : > { %v2849_v56 = vld [vmem:[#allocation4 + $0x120] sm:$0xff]   ;;  %v2852_v59 = vld [vmem:[#allocation4 + $0x1e8] sm:$0xff]   ;;  %v2856_v63 = vld [vmem:[#allocation4 + $0x1f0] sm:$0xff]  }
 0x11a   : > { %2561 = vmatpush3.bf16.msra.mxu0 %v2813_v18  ;;  %v2850_v57 = vld [vmem:[#allocation4 + $0x1a0] sm:$0xff]   ;;  %v2853_v60 = vld [vmem:[#allocation4 + $0x128] sm:$0xff]   ;;  %v2857_v0 = vld [vmem:[#allocation4 + $0x130] sm:$0xff]  }
 0x11b   : > { %2583 = vmatpush3.bf16.msra.mxu1 %v2814_v19  ;;  %2562 = vmatprep.subr.bf16.mxu0 %v2815_v20  ;;  %v2854_v61 = vld [vmem:[#allocation4 + $0x1a8] sm:$0xff]   ;;  %v2858_v1 = vld [vmem:[#allocation4 + $0x1b0] sm:$0xff]   ;;  %v2859_v2 = vld [vmem:[#allocation4 + $0x178] sm:$0xff]  }
 0x11c   : > { %2584 = vmatprep.subr.bf16.mxu1 %v2816_v21  ;;  %v2860_v3 = vld [vmem:[#allocation4 + $0x1f8] sm:$0xff]   ;;  %v533_v9 = vld [vmem:[%s3908_s9 + $0x18] sm:$0xff] }
 0x11d   : > { %v2861_v4 = vld [vmem:[#allocation4 + $0x138] sm:$0xff]   ;;  %v2373_v10 = vcombine.low %v533_v9, %v533_v9  ;;  %v2374_v11 = vcombine.high %v533_v9, %v533_v9  ;;  %v2867_v12 = vld [vmem:[#allocation8] sm:$0xff]   ;;  %v2868_v14 = vld [vmem:[#allocation8 + $0x8] sm:$0xff]  }
 0x11e   : > { %2563 = vmatpush3.bf16.msra.mxu0 %v2817_v22  ;;  %v2862_v5 = vld [vmem:[#allocation4 + $0x1b8] sm:$0xff]   ;;  %v2871_v17 = vld [vmem:[#allocation8 + $0x20] sm:$0xff]   ;;  %v2872_v18 = vld [vmem:[#allocation8 + $0x28] sm:$0xff]  }
 0x11f   : > { %2585 = vmatpush3.bf16.msra.mxu1 %v2818_v23  ;;  %2564 = vmatprep.subr.bf16.mxu0 %v2819_v24  ;;  %v532_v6 = vld [vmem:[%s3908_s9 + $0x10] sm:$0xff]  ;;  %v2869_v15 = vld [vmem:[#allocation8 + $0x10] sm:$0xff]  }
 0x120   : > { %2586 = vmatprep.subr.bf16.mxu1 %v2820_v25  ;;  %v2371_v7 = vcombine.low %v532_v6, %v532_v6  ;;  %v2372_v8 = vcombine.high %v532_v6, %v532_v6  ;;  %v2870_v16 = vld [vmem:[#allocation8 + $0x18] sm:$0xff]   ;;  %v2873_v19 = vld [vmem:[#allocation8 + $0x30] sm:$0xff]  }
 0x121   : > { %v2874_v20 = vld [vmem:[#allocation8 + $0x38] sm:$0xff]  }
 0x122   : > { %2565 = vmatpush3.bf16.msra.mxu0 %v2821_v26  ;;  %v2366_v23 = vld [vmem:[#allocation6] ss:$0 sm:$0xff] }
 0x123   : > { %2587 = vmatpush3.bf16.msra.mxu1 %v2822_v27  ;;  %2566 = vmatprep.subr.bf16.mxu0 %v2823_v28 }
 0x124   : > { %2588 = vmatprep.subr.bf16.mxu1 %v2824_v29 }
 0x126   : > { %2567 = vmatpush3.bf16.msra.mxu0 %v2825_v30 }
 0x127   : > { %2589 = vmatpush3.bf16.msra.mxu1 %v2826_v31  ;;  %2596 = vmatprep.subr.bf16.mxu0 %v2831_v38 }
 0x128   : > { %2618 = vmatprep.subr.bf16.mxu1 %v2832_v39 }
 0x129   : > { %1114 = vmatmul.mubr.bf16.vlgmr.msra.gmra.mrb[0].mxu0 %v2367_v34 }
 0x12a   : > { %1154 = vmatmul.mubr.bf16.vlgmr.msra.gmra.mrb[0].mxu1 %v2369_v36  ;;  %2597 = vmatpush3.bf16.msra.mxu0 %v2833_v40 }
 0x12b   : > { %2619 = vmatpush3.bf16.msra.mxu1 %v2834_v41  ;;  %2598 = vmatprep.subr.bf16.mxu0 %v2835_v42 }
 0x12c   : > { %2620 = vmatprep.subr.bf16.mxu1 %v2836_v43  ;;  %1193 = vmatprep.mubr.bf16.mxu0 %v2372_v8 }
 0x12d   : > { %1233 = vmatprep.mubr.bf16.mxu1 %v2374_v11 }
 0x12e   : > { %2599 = vmatpush3.bf16.msra.mxu0 %v2837_v44 }
 0x12f   : > { %2621 = vmatpush3.bf16.msra.mxu1 %v2838_v45  ;;  %2600 = vmatprep.subr.bf16.mxu0 %v2839_v46 }
 0x130   : > { %2622 = vmatprep.subr.bf16.mxu1 %v2840_v47 }
 0x132   : > { %2601 = vmatpush3.bf16.msra.mxu0 %v2841_v48  ;;  %v2439_v48 = vld [vmem:[#allocation9] ss:$0 sm:$0xff] }
 0x133   : > { %2623 = vmatpush3.bf16.msra.mxu1 %v2842_v49  ;;  %2602 = vmatprep.subr.bf16.mxu0 %v2843_v50 }
 0x134   : > { %2624 = vmatprep.subr.bf16.mxu1 %v2844_v51 }
 0x136   : > { %2603 = vmatpush3.bf16.msra.mxu0 %v2845_v52 }
 0x137   : > { %2625 = vmatpush3.bf16.msra.mxu1 %v2846_v53  ;;  %2604 = vmatprep.subr.bf16.mxu0 %v2847_v54 }
 0x138   : > { %2626 = vmatprep.subr.bf16.mxu1 %v2848_v55 }
 0x13a   : > { %2605 = vmatpush3.bf16.msra.mxu0 %v2849_v56 }
 0x13b   : > { %2627 = vmatpush3.bf16.msra.mxu1 %v2850_v57  ;;  %2606 = vmatprep.subr.bf16.mxu0 %v2851_v58 }
 0x13c   : > { %2628 = vmatprep.subr.bf16.mxu1 %v2852_v59 }
 0x13e   : > { %2607 = vmatpush3.bf16.msra.mxu0 %v2853_v60 }
 0x13f   : > { %2629 = vmatpush3.bf16.msra.mxu1 %v2854_v61  ;;  %2608 = vmatprep.subr.bf16.mxu0 %v2855_v62 }
 0x140   : > { %2630 = vmatprep.subr.bf16.mxu1 %v2856_v63 }
 0x142   : > { %2609 = vmatpush3.bf16.msra.mxu0 %v2857_v0 }
 0x143   : > { %2631 = vmatpush3.bf16.msra.mxu1 %v2858_v1  ;;  %2610 = vmatprep.subr.bf16.mxu0 %v2859_v2 }
 0x144   : > { %2632 = vmatprep.subr.bf16.mxu1 %v2860_v3 }
 0x146   : > { %2611 = vmatpush3.bf16.msra.mxu0 %v2861_v4 }
 0x147   : > { %2633 = vmatpush3.bf16.msra.mxu1 %v2862_v5  ;;  %2649 = vmatprep.subr.bf16.mxu0 %v3334_v13 }
 0x149   : > { %1194 = vmatmul.mubr.bf16.vlgmr.msra.gmra.mrb[4].mxu0 %v2371_v7 }
 0x14a   : > { %1234 = vmatmul.mubr.bf16.vlgmr.msra.gmra.mrb[4].mxu1 %v2373_v10  ;;  %2650 = vmatpush3.bf16.msra.mxu0 %v2867_v12 }
 0x14b   : > { %2651 = vmatprep.subr.bf16.mxu0 %v3334_v13  ;;  %2665 = vmatprep.mubr.msk.bf16.mxu0 %vm3335_vm0, %v3334_v13 }
 0x14e   : > { %2652 = vmatpush3.bf16.msra.mxu0 %v2868_v14 }
 0x14f   : > { %2653 = vmatprep.subr.bf16.mxu0 %v3334_v13 }
 0x152   : > { %2654 = vmatpush3.bf16.msra.mxu0 %v2869_v15 }
 0x153   : > { %2655 = vmatprep.subr.bf16.mxu0 %v3334_v13 }
 0x156   : > { %2656 = vmatpush3.bf16.msra.mxu0 %v2870_v16 }
 0x157   : > { %2657 = vmatprep.subr.bf16.mxu0 %v3334_v13 }
 0x15a   : > { %2658 = vmatpush3.bf16.msra.mxu0 %v2871_v17 }
 0x15b   : > { %2659 = vmatprep.subr.bf16.mxu0 %v3334_v13 }
 0x15e   : > { %2660 = vmatpush3.bf16.msra.mxu0 %v2872_v18 }
 0x15f   : > { %2661 = vmatprep.subr.bf16.mxu0 %v3334_v13 }
 0x162   : > { %2662 = vmatpush3.bf16.msra.mxu0 %v2873_v19 }
 0x163   : > { %2663 = vmatprep.subr.bf16.mxu0 %v3334_v13 }
 0x166   : > { %2664 = vmatpush3.bf16.msra.mxu0 %v2874_v20 }
 0x1fc   : > { %v2568_v21 = vpop.f32.mrb[0].mxu0 }
 0x1fd   : > { %v2590_v22 = vpop.f32.mrb[0].mxu1  ;;  %v2569_v24 = vpop.f32.mrb[1].mxu0 }
 0x1fe   : > { %v2591_v25 = vpop.f32.mrb[1].mxu1  ;;  %v2570_v26 = vadd.f32 %v2569_v24, %v2568_v21  ;;  %v2571_v28 = vpop.f32.mrb[2].mxu0 }
 0x1ff   : > { %v2592_v27 = vadd.f32 %v2591_v25, %v2590_v22  ;;  %v2593_v29 = vpop.f32.mrb[2].mxu1  ;;  %v2572_v30 = vpop.f32.mrb[3].mxu0 }
 0x200   : > { %v2594_v31 = vpop.f32.mrb[3].mxu1  ;;  %v1116_v32 = vadd.f32 %v2570_v26, %v2366_v23 }
 0x202   : > { %v1156_v33 = vadd.f32 %v2592_v27, %v1116_v32 }
 0x21c   : > { %v2612_v34 = vpop.f32.mrb[4].mxu0 }
 0x21d   : > { %v2634_v35 = vpop.f32.mrb[4].mxu1  ;;  %v2613_v36 = vpop.f32.mrb[5].mxu0 }
 0x21e   : > { %v2635_v37 = vpop.f32.mrb[5].mxu1  ;;  %v2614_v38 = vadd.f32 %v2613_v36, %v2612_v34  ;;  %v2615_v40 = vpop.f32.mrb[6].mxu0 }
 0x21f   : > { %v2636_v39 = vadd.f32 %v2635_v37, %v2634_v35  ;;  %v2637_v41 = vpop.f32.mrb[6].mxu1  ;;  %v2616_v42 = vpop.f32.mrb[7].mxu0 }
 0x220   : > { %v2638_v43 = vpop.f32.mrb[7].mxu1  ;;  %v1196_v44 = vadd.f32 %v2614_v38, %v1156_v33 }
 0x222   : > { %v1236_v45 = vadd.f32 %v2636_v39, %v1196_v44 }
 0x224   : > { %v1241_v46 = vmax.f32 %v1236_v45, 0.0 }
 0x226   : > { %v1242_v47 = vpack.c.bf16 %v1241_v46, %v1241_v46 }
 0x228   : > { %1243 = vst [vmem:[#allocation2] sm:$0xf] %v1242_v47  ;;  %2666 = vmatmul.mubr.bf16.vlgmr.msra.gmra.mrb[8].mxu0 %v1242_v47 }
 0x2fb   : > { %v1349_v49 = vpop.f32.mrb[8].mxu0 }
 0x2fc   : > { %v1350_v50 = vadd.f32 %v2439_v48, %v1349_v49  ;;  %v2667_v51 = vpop.f32.mrb[9].mxu0 }
 0x2fd   : > { %v1352_v52 = vpop.f32.mrb[10].mxu0 }
 0x2fe   : > { %1355 = vst [vmem:[%s3909_s30] sm:$0xff] %v1350_v50  ;;  %v2668_v53 = vpop.f32.mrb[11].mxu0 }
 0x2ff PF: > { %v2875_v54 = vld [vmem:[%s3688_s26 + $0x4] ss:$16 sps:$4 sm:$0xff]   ;;  %v2877_v55 = vld [vmem:[%s3688_s26 + $0xc] ss:$16 sps:$4 sm:$0xff]   ;;  %v3336_v56 = vmov 0   ;;  %s3910_s27 = sld [smem:[#allocation22_spill]] }
 0x300   : > { %1605 = vmatprep.mubr.bf16.mxu0 %v3336_v56  ;;  %1646 = vmatprep.mubr.bf16.mxu1 %v3336_v56  ;;  %v2879_v57 = vld [vmem:[%s3688_s26] ss:$16 sps:$4 sm:$0xff]   ;;  %v2880_v58 = vld [vmem:[%s3688_s26 + $0x8] ss:$16 sps:$4 sm:$0xff]   ;;  %v2881_v59 = vld [vmem:[%s3688_s26 + $0x24] ss:$16 sps:$4 sm:$0xff]  }
 0x301   : > { %1573 = vmatprep.subr.bf16.mxu0 %v2875_v54  ;;  %1614 = vmatprep.subr.bf16.mxu1 %v2877_v55  ;;  %v2883_v60 = vld [vmem:[%s3688_s26 + $0x2c] ss:$16 sps:$4 sm:$0xff]   ;;  %v2885_v61 = vld [vmem:[%s3688_s26 + $0x20] ss:$16 sps:$4 sm:$0xff]   ;;  %v2886_v62 = vld [vmem:[%s3688_s26 + $0x28] ss:$16 sps:$4 sm:$0xff]  }
 0x302   : > { %1574 = vmatpush1.bf16.msra.mxu0 %v2879_v57  ;;  %1615 = vmatpush1.bf16.msra.mxu1 %v2880_v58  ;;  %v2887_v63 = vld [vmem:[%s3688_s26 + $0x44] ss:$16 sps:$4 sm:$0xff]   ;;  %v2889_v0 = vld [vmem:[%s3688_s26 + $0x4c] ss:$16 sps:$4 sm:$0xff]   ;;  %v2891_v1 = vld [vmem:[%s3688_s26 + $0x40] ss:$16 sps:$4 sm:$0xff]  }
 0x303   : > { %1575 = vmatprep.subr.bf16.mxu0 %v2881_v59  ;;  %1616 = vmatprep.subr.bf16.mxu1 %v2883_v60  ;;  %v2892_v2 = vld [vmem:[%s3688_s26 + $0x48] ss:$16 sps:$4 sm:$0xff]   ;;  %v2893_v3 = vld [vmem:[%s3688_s26 + $0x64] ss:$16 sps:$4 sm:$0xff]   ;;  %v2895_v4 = vld [vmem:[%s3688_s26 + $0x6c] ss:$16 sps:$4 sm:$0xff]  }
 0x304   : > { %v2897_v5 = vld [vmem:[%s3688_s26 + $0x60] ss:$16 sps:$4 sm:$0xff]   ;;  %v2898_v6 = vld [vmem:[%s3688_s26 + $0x68] ss:$16 sps:$4 sm:$0xff]   ;;  %v2899_v7 = vld [vmem:[%s3688_s26 + $0x84] ss:$16 sps:$4 sm:$0xff]  }
 0x305   : > { %v2901_v8 = vld [vmem:[%s3688_s26 + $0x8c] ss:$16 sps:$4 sm:$0xff]   ;;  %v2903_v9 = vld [vmem:[%s3688_s26 + $0x80] ss:$16 sps:$4 sm:$0xff]   ;;  %v2904_v10 = vld [vmem:[%s3688_s26 + $0x88] ss:$16 sps:$4 sm:$0xff]  }
 0x306   : > { %1576 = vmatpush1.bf16.msra.mxu0 %v2885_v61  ;;  %1617 = vmatpush1.bf16.msra.mxu1 %v2886_v62  ;;  %v2905_v11 = vld [vmem:[%s3688_s26 + $0xa4] ss:$16 sps:$4 sm:$0xff]   ;;  %v2907_v12 = vld [vmem:[%s3688_s26 + $0xac] ss:$16 sps:$4 sm:$0xff]   ;;  %v2909_v13 = vld [vmem:[%s3688_s26 + $0xa0] ss:$16 sps:$4 sm:$0xff]  }
 0x307   : > { %1577 = vmatprep.subr.bf16.mxu0 %v2887_v63  ;;  %1618 = vmatprep.subr.bf16.mxu1 %v2889_v0  ;;  %v2910_v14 = vld [vmem:[%s3688_s26 + $0xa8] ss:$16 sps:$4 sm:$0xff]   ;;  %v2911_v15 = vld [vmem:[%s3688_s26 + $0xc4] ss:$16 sps:$4 sm:$0xff]   ;;  %v2913_v16 = vld [vmem:[%s3688_s26 + $0xcc] ss:$16 sps:$4 sm:$0xff]  }
 0x308   : > { %v2915_v17 = vld [vmem:[%s3688_s26 + $0xc0] ss:$16 sps:$4 sm:$0xff]   ;;  %v2916_v18 = vld [vmem:[%s3688_s26 + $0xc8] ss:$16 sps:$4 sm:$0xff]   ;;  %v2917_v19 = vld [vmem:[%s3688_s26 + $0xe4] ss:$16 sps:$4 sm:$0xff]  }
 0x309   : > { %v2919_v20 = vld [vmem:[%s3688_s26 + $0xec] ss:$16 sps:$4 sm:$0xff]   ;;  %v2921_v21 = vld [vmem:[%s3688_s26 + $0xe0] ss:$16 sps:$4 sm:$0xff]   ;;  %v2922_v22 = vld [vmem:[%s3688_s26 + $0xe8] ss:$16 sps:$4 sm:$0xff]  }
 0x30a   : > { %1578 = vmatpush1.bf16.msra.mxu0 %v2891_v1  ;;  %1619 = vmatpush1.bf16.msra.mxu1 %v2892_v2  ;;  %v2925_v23 = vld [vmem:[%s3696_s25 + $0x4] ss:$8 sps:$4 sm:$0xff]   ;;  %v1358_v25 = vld [vmem:[#allocation2] sm:$0xf]  ;;  %v2931_v28 = vld [vmem:[%s3696_s25 + $0x14] ss:$8 sps:$4 sm:$0xff]  }
 0x30b   : > { %1579 = vmatprep.subr.bf16.mxu0 %v2893_v3  ;;  %1620 = vmatprep.subr.bf16.mxu1 %v2895_v4  ;;  %v2928_v24 = vld [vmem:[%s3696_s25 + $0x104] ss:$8 sps:$4 sm:$0xff]   ;;  %v2923_v26 = vld [vmem:[%s3696_s25] ss:$8 sps:$4 sm:$0xff]   ;;  %v2934_v29 = vld [vmem:[%s3696_s25 + $0x114] ss:$8 sps:$4 sm:$0xff]  }
 0x30c   : > { %v2926_v27 = vld [vmem:[%s3696_s25 + $0x100] ss:$8 sps:$4 sm:$0xff]   ;;  %v2929_v30 = vld [vmem:[%s3696_s25 + $0x10] ss:$8 sps:$4 sm:$0xff]   ;;  %v2937_v32 = vld [vmem:[%s3696_s25 + $0x24] ss:$8 sps:$4 sm:$0xff]  }
 0x30d   : > { %v2932_v31 = vld [vmem:[%s3696_s25 + $0x110] ss:$8 sps:$4 sm:$0xff]   ;;  %v2940_v33 = vld [vmem:[%s3696_s25 + $0x124] ss:$8 sps:$4 sm:$0xff]   ;;  %v2935_v34 = vld [vmem:[%s3696_s25 + $0x20] ss:$8 sps:$4 sm:$0xff]  }
 0x30e   : > { %1580 = vmatpush1.bf16.msra.mxu0 %v2897_v5  ;;  %1621 = vmatpush1.bf16.msra.mxu1 %v2898_v6  ;;  %v2938_v35 = vld [vmem:[%s3696_s25 + $0x120] ss:$8 sps:$4 sm:$0xff]   ;;  %v2943_v36 = vld [vmem:[%s3696_s25 + $0x34] ss:$8 sps:$4 sm:$0xff]   ;;  %v2941_v38 = vld [vmem:[%s3696_s25 + $0x30] ss:$8 sps:$4 sm:$0xff]  }
 0x30f   : > { %1581 = vmatprep.subr.bf16.mxu0 %v2899_v7  ;;  %1622 = vmatprep.subr.bf16.mxu1 %v2901_v8  ;;  %v2946_v37 = vld [vmem:[%s3696_s25 + $0x134] ss:$8 sps:$4 sm:$0xff]   ;;  %v2944_v39 = vld [vmem:[%s3696_s25 + $0x130] ss:$8 sps:$4 sm:$0xff]   ;;  %v2949_v40 = vld [vmem:[%s3696_s25 + $0x44] ss:$8 sps:$4 sm:$0xff]  }
 0x310   : > { %v2952_v41 = vld [vmem:[%s3696_s25 + $0x144] ss:$8 sps:$4 sm:$0xff]   ;;  %v2947_v42 = vld [vmem:[%s3696_s25 + $0x40] ss:$8 sps:$4 sm:$0xff]   ;;  %v2955_v44 = vld [vmem:[%s3696_s25 + $0x54] ss:$8 sps:$4 sm:$0xff]  }
 0x311   : > { %v2950_v43 = vld [vmem:[%s3696_s25 + $0x140] ss:$8 sps:$4 sm:$0xff]   ;;  %v2958_v45 = vld [vmem:[%s3696_s25 + $0x154] ss:$8 sps:$4 sm:$0xff]   ;;  %v2953_v46 = vld [vmem:[%s3696_s25 + $0x50] ss:$8 sps:$4 sm:$0xff]  }
 0x312   : > { %1582 = vmatpush1.bf16.msra.mxu0 %v2903_v9  ;;  %1623 = vmatpush1.bf16.msra.mxu1 %v2904_v10  ;;  %v2956_v47 = vld [vmem:[%s3696_s25 + $0x150] ss:$8 sps:$4 sm:$0xff]   ;;  %v2961_v48 = vld [vmem:[%s3696_s25 + $0x64] ss:$8 sps:$4 sm:$0xff]   ;;  %v2959_v50 = vld [vmem:[%s3696_s25 + $0x60] ss:$8 sps:$4 sm:$0xff]  }
 0x313   : > { %1583 = vmatprep.subr.bf16.mxu0 %v2905_v11  ;;  %1624 = vmatprep.subr.bf16.mxu1 %v2907_v12  ;;  %v2964_v49 = vld [vmem:[%s3696_s25 + $0x164] ss:$8 sps:$4 sm:$0xff]   ;;  %v2962_v51 = vld [vmem:[%s3696_s25 + $0x160] ss:$8 sps:$4 sm:$0xff]   ;;  %v2967_v52 = vld [vmem:[%s3696_s25 + $0x74] ss:$8 sps:$4 sm:$0xff]  }
 0x314   : > { %v2970_v53 = vld [vmem:[%s3696_s25 + $0x174] ss:$8 sps:$4 sm:$0xff]   ;;  %v2965_v54 = vld [vmem:[%s3696_s25 + $0x70] ss:$8 sps:$4 sm:$0xff]   ;;  %v2973_v56 = vld [vmem:[%s3696_s25 + $0x84] ss:$8 sps:$4 sm:$0xff]  }
 0x315   : > { %v2968_v55 = vld [vmem:[%s3696_s25 + $0x170] ss:$8 sps:$4 sm:$0xff]   ;;  %v2976_v57 = vld [vmem:[%s3696_s25 + $0x184] ss:$8 sps:$4 sm:$0xff]   ;;  %v2971_v58 = vld [vmem:[%s3696_s25 + $0x80] ss:$8 sps:$4 sm:$0xff]  }
 0x316   : > { %1584 = vmatpush1.bf16.msra.mxu0 %v2909_v13  ;;  %1625 = vmatpush1.bf16.msra.mxu1 %v2910_v14  ;;  %v2974_v59 = vld [vmem:[%s3696_s25 + $0x180] ss:$8 sps:$4 sm:$0xff]   ;;  %v2979_v60 = vld [vmem:[%s3696_s25 + $0x94] ss:$8 sps:$4 sm:$0xff]   ;;  %v2977_v62 = vld [vmem:[%s3696_s25 + $0x90] ss:$8 sps:$4 sm:$0xff]  }
 0x317   : > { %1585 = vmatprep.subr.bf16.mxu0 %v2911_v15  ;;  %1626 = vmatprep.subr.bf16.mxu1 %v2913_v16  ;;  %v2982_v61 = vld [vmem:[%s3696_s25 + $0x194] ss:$8 sps:$4 sm:$0xff]   ;;  %v2980_v63 = vld [vmem:[%s3696_s25 + $0x190] ss:$8 sps:$4 sm:$0xff]   ;;  %v2985_v0 = vld [vmem:[%s3696_s25 + $0xa4] ss:$8 sps:$4 sm:$0xff]  }
 0x318   : > { %v2988_v1 = vld [vmem:[%s3696_s25 + $0x1a4] ss:$8 sps:$4 sm:$0xff]   ;;  %v2983_v2 = vld [vmem:[%s3696_s25 + $0xa0] ss:$8 sps:$4 sm:$0xff]   ;;  %v2991_v4 = vld [vmem:[%s3696_s25 + $0xb4] ss:$8 sps:$4 sm:$0xff]  }
 0x319   : > { %v2986_v3 = vld [vmem:[%s3696_s25 + $0x1a0] ss:$8 sps:$4 sm:$0xff]   ;;  %v2994_v5 = vld [vmem:[%s3696_s25 + $0x1b4] ss:$8 sps:$4 sm:$0xff]   ;;  %v2989_v6 = vld [vmem:[%s3696_s25 + $0xb0] ss:$8 sps:$4 sm:$0xff]  }
 0x31a   : > { %1586 = vmatpush1.bf16.msra.mxu0 %v2915_v17  ;;  %1627 = vmatpush1.bf16.msra.mxu1 %v2916_v18  ;;  %v2992_v7 = vld [vmem:[%s3696_s25 + $0x1b0] ss:$8 sps:$4 sm:$0xff]   ;;  %v2997_v8 = vld [vmem:[%s3696_s25 + $0xc4] ss:$8 sps:$4 sm:$0xff]   ;;  %v2995_v10 = vld [vmem:[%s3696_s25 + $0xc0] ss:$8 sps:$4 sm:$0xff]  }
 0x31b   : > { %1587 = vmatprep.subr.bf16.mxu0 %v2917_v19  ;;  %1628 = vmatprep.subr.bf16.mxu1 %v2919_v20  ;;  %v3000_v9 = vld [vmem:[%s3696_s25 + $0x1c4] ss:$8 sps:$4 sm:$0xff]   ;;  %v2998_v11 = vld [vmem:[%s3696_s25 + $0x1c0] ss:$8 sps:$4 sm:$0xff]   ;;  %v3003_v12 = vld [vmem:[%s3696_s25 + $0xd4] ss:$8 sps:$4 sm:$0xff]  }
 0x31c   : > { %v3006_v13 = vld [vmem:[%s3696_s25 + $0x1d4] ss:$8 sps:$4 sm:$0xff]   ;;  %v3001_v14 = vld [vmem:[%s3696_s25 + $0xd0] ss:$8 sps:$4 sm:$0xff]   ;;  %v3009_v16 = vld [vmem:[%s3696_s25 + $0xe4] ss:$8 sps:$4 sm:$0xff]  }
 0x31d   : > { %v3004_v15 = vld [vmem:[%s3696_s25 + $0x1d0] ss:$8 sps:$4 sm:$0xff]   ;;  %v3012_v17 = vld [vmem:[%s3696_s25 + $0x1e4] ss:$8 sps:$4 sm:$0xff]   ;;  %v3007_v18 = vld [vmem:[%s3696_s25 + $0xe0] ss:$8 sps:$4 sm:$0xff]  }
 0x31e   : > { %1588 = vmatpush1.bf16.msra.mxu0 %v2921_v21  ;;  %1629 = vmatpush1.bf16.msra.mxu1 %v2922_v22  ;;  %v3010_v19 = vld [vmem:[%s3696_s25 + $0x1e0] ss:$8 sps:$4 sm:$0xff]   ;;  %v3015_v20 = vld [vmem:[%s3696_s25 + $0xf4] ss:$8 sps:$4 sm:$0xff]   ;;  %v3013_v22 = vld [vmem:[%s3696_s25 + $0xf0] ss:$8 sps:$4 sm:$0xff]  }
 0x31f   : > { %2049 = vmatprep.subr.bf16.mxu0 %v2925_v23  ;;  %2090 = vmatprep.subr.bf16.mxu1 %v2928_v24  ;;  %v3018_v21 = vld [vmem:[%s3696_s25 + $0x1f4] ss:$8 sps:$4 sm:$0xff]   ;;  %v3016_v23 = vld [vmem:[%s3696_s25 + $0x1f0] ss:$8 sps:$4 sm:$0xff]   ;;  %v1393_v24 = vlaneseq  ;;  %p2544_p6 = scmp.ne.s32.totalorder %s3910_s27, 7 }
 0x320   : > { %s3911_s29 = sld [smem:[#allocation30_spill]] (!%p2544_p6) }
 0x321   : > { %1606 = vmatmul.mubr.bf16.vlgmr.msra.gmra.mrb[0].mxu0 %v1358_v25  ;;  %1647 = vmatmul.mubr.bf16.vlgmr.msra.gmra.mrb[0].mxu1 %v1358_v25  ;;  %v1394_v25 = vshrl.u32 %v1393_v24, 7 }
 0x322   : > { %2050 = vmatpush1.bf16.msra.mxu0 %v2923_v26  ;;  %2091 = vmatpush1.bf16.msra.mxu1 %v2926_v27 }
 0x323   : > { %2051 = vmatprep.subr.bf16.mxu0 %v2931_v28  ;;  %2092 = vmatprep.subr.bf16.mxu1 %v2934_v29  ;;  %v1395_v26 = vsub.s32 0, %v1394_v25  ;;  %v1403_v27 = vsub.s32 2, %v1394_v25  ;;  %v1391_v28 = vld [vmem:[%s3694_s11] sm:$0xf]  ;;  %v1399_v29 = vsub.s32 1, %v1394_v25 }
 0x326   : > { %2052 = vmatpush1.bf16.msra.mxu0 %v2929_v30  ;;  %2093 = vmatpush1.bf16.msra.mxu1 %v2932_v31  ;;  %v1407_v30 = vsub.s32 3, %v1394_v25  ;;  %v1396_v31 = vrot.slane %v1391_v28, %v1395_v26 }
 0x327   : > { %2053 = vmatprep.subr.bf16.mxu0 %v2937_v32  ;;  %2094 = vmatprep.subr.bf16.mxu1 %v2940_v33  ;;  %v1404_v32 = vrot.slane %v1391_v28, %v1403_v27  ;;  %v1400_v33 = vrot.slane %v1391_v28, %v1399_v29 }
 0x32a   : > { %2054 = vmatpush1.bf16.msra.mxu0 %v2935_v34  ;;  %2095 = vmatpush1.bf16.msra.mxu1 %v2938_v35  ;;  %v1408_v34 = vrot.slane %v1391_v28, %v1407_v30 }
 0x32b   : > { %2055 = vmatprep.subr.bf16.mxu0 %v2943_v36  ;;  %2096 = vmatprep.subr.bf16.mxu1 %v2946_v37 }
 0x32e   : > { %2056 = vmatpush1.bf16.msra.mxu0 %v2941_v38  ;;  %2097 = vmatpush1.bf16.msra.mxu1 %v2944_v39 }
 0x32f   : > { %2057 = vmatprep.subr.bf16.mxu0 %v2949_v40  ;;  %2098 = vmatprep.subr.bf16.mxu1 %v2952_v41 }
 0x332   : > { %2058 = vmatpush1.bf16.msra.mxu0 %v2947_v42  ;;  %2099 = vmatpush1.bf16.msra.mxu1 %v2950_v43 }
 0x333   : > { %2059 = vmatprep.subr.bf16.mxu0 %v2955_v44  ;;  %2100 = vmatprep.subr.bf16.mxu1 %v2958_v45 }
 0x336   : > { %2060 = vmatpush1.bf16.msra.mxu0 %v2953_v46  ;;  %2101 = vmatpush1.bf16.msra.mxu1 %v2956_v47 }
 0x337   : > { %2061 = vmatprep.subr.bf16.mxu0 %v2961_v48  ;;  %2102 = vmatprep.subr.bf16.mxu1 %v2964_v49 }
 0x33a   : > { %2062 = vmatpush1.bf16.msra.mxu0 %v2959_v50  ;;  %2103 = vmatpush1.bf16.msra.mxu1 %v2962_v51 }
 0x33b   : > { %2063 = vmatprep.subr.bf16.mxu0 %v2967_v52  ;;  %2104 = vmatprep.subr.bf16.mxu1 %v2970_v53 }
 0x33e   : > { %2064 = vmatpush1.bf16.msra.mxu0 %v2965_v54  ;;  %2105 = vmatpush1.bf16.msra.mxu1 %v2968_v55 }
 0x33f   : > { %2065 = vmatprep.subr.bf16.mxu0 %v2973_v56  ;;  %2106 = vmatprep.subr.bf16.mxu1 %v2976_v57  ;;  %v1659_v56 = vld [vmem:[#allocation3] sm:$0xff] }
 0x342   : > { %2066 = vmatpush1.bf16.msra.mxu0 %v2971_v58  ;;  %2107 = vmatpush1.bf16.msra.mxu1 %v2974_v59 }
 0x343   : > { %2067 = vmatprep.subr.bf16.mxu0 %v2979_v60  ;;  %2108 = vmatprep.subr.bf16.mxu1 %v2982_v61  ;;  %v1660_v60 = vld [vmem:[#allocation3 + $0x8] sm:$0xff] }
 0x346   : > { %2068 = vmatpush1.bf16.msra.mxu0 %v2977_v62  ;;  %2109 = vmatpush1.bf16.msra.mxu1 %v2980_v63 }
 0x347   : > { %2069 = vmatprep.subr.bf16.mxu0 %v2985_v0  ;;  %2110 = vmatprep.subr.bf16.mxu1 %v2988_v1 }
 0x34a   : > { %2070 = vmatpush1.bf16.msra.mxu0 %v2983_v2  ;;  %2111 = vmatpush1.bf16.msra.mxu1 %v2986_v3 }
 0x34b   : > { %2071 = vmatprep.subr.bf16.mxu0 %v2991_v4  ;;  %2112 = vmatprep.subr.bf16.mxu1 %v2994_v5 }
 0x34e   : > { %2072 = vmatpush1.bf16.msra.mxu0 %v2989_v6  ;;  %2113 = vmatpush1.bf16.msra.mxu1 %v2992_v7  ;;  %v2141_v7 = vld [vmem:[#allocation14] sm:$0x3] (!%p2544_p6) }
 0x34f   : > { %2073 = vmatprep.subr.bf16.mxu0 %v2997_v8  ;;  %2114 = vmatprep.subr.bf16.mxu1 %v3000_v9  ;;  %v2146_v8 = vrot.slane (!%p2544_p6), %v2141_v7, %v1395_v26  ;;  %v2150_v9 = vrot.slane (!%p2544_p6), %v2141_v7, %v1399_v29 }
 0x352   : > { %2074 = vmatpush1.bf16.msra.mxu0 %v2995_v10  ;;  %2115 = vmatpush1.bf16.msra.mxu1 %v2998_v11 }
 0x353   : > { %2075 = vmatprep.subr.bf16.mxu0 %v3003_v12  ;;  %2116 = vmatprep.subr.bf16.mxu1 %v3006_v13 }
 0x356   : > { %2076 = vmatpush1.bf16.msra.mxu0 %v3001_v14  ;;  %2117 = vmatpush1.bf16.msra.mxu1 %v3004_v15 }
 0x357   : > { %2077 = vmatprep.subr.bf16.mxu0 %v3009_v16  ;;  %2118 = vmatprep.subr.bf16.mxu1 %v3012_v17 }
 0x35a   : > { %2078 = vmatpush1.bf16.msra.mxu0 %v3007_v18  ;;  %2119 = vmatpush1.bf16.msra.mxu1 %v3010_v19 }
 0x35b   : > { %2079 = vmatprep.subr.bf16.mxu0 %v3015_v20  ;;  %2120 = vmatprep.subr.bf16.mxu1 %v3018_v21 }
 0x35e   : > { %2080 = vmatpush1.bf16.msra.mxu0 %v3013_v22  ;;  %2121 = vmatpush1.bf16.msra.mxu1 %v3016_v23 }
 0x3f4   : > { %v1607_v35 = vpop.f32.mrb[0].mxu0  ;;  %v1648_v36 = vpop.f32.mrb[0].mxu1 }
 0x3f5   : > { %v1608_v37 = vadd.f32 %v1607_v35, %v1396_v31  ;;  %v1649_v38 = vadd.f32 %v1648_v36, %v1404_v32  ;;  %v1609_v39 = vpop.f32.mrb[1].mxu0  ;;  %v1650_v40 = vpop.f32.mrb[1].mxu1 }
 0x3f6   : > { %v1610_v41 = vadd.f32 %v1609_v39, %v1400_v33  ;;  %v1651_v42 = vadd.f32 %v1650_v40, %v1408_v34  ;;  %v1611_v43 = vpop.f32.mrb[2].mxu0  ;;  %v1652_v44 = vpop.f32.mrb[2].mxu1 }
 0x3f7   : > { %v1655_v45 = vmax.f32 %v1608_v37, 0.0  ;;  %v1657_v46 = vmax.f32 %v1649_v38, 0.0  ;;  %v1612_v47 = vpop.f32.mrb[3].mxu0  ;;  %v1653_v48 = vpop.f32.mrb[3].mxu1 }
 0x3f8   : > { %v1656_v49 = vmax.f32 %v1610_v41, 0.0  ;;  %v1658_v50 = vmax.f32 %v1651_v42, 0.0 }
 0x3f9   : > { %v1661_v53 = vpack.c.bf16 %v1655_v45, %v1655_v45  ;;  %v1663_v54 = vpack.c.bf16 %v1657_v46, %v1657_v46 }
 0x3fa   : > { %v1662_v51 = vpack.c.bf16 %v1656_v49, %v1656_v49  ;;  %v1664_v52 = vpack.c.bf16 %v1658_v50, %v1658_v50 }
 0x3fc   : > { %2081 = vmatprep.mubr.bf16.mxu0 %v1662_v51  ;;  %2122 = vmatprep.mubr.bf16.mxu1 %v1664_v52 }
 0x3fd   : > { %2082 = vmatmul.mubr.bf16.vlgmr.msra.gmra.mrb[4].mxu0 %v1661_v53  ;;  %2123 = vmatmul.mubr.bf16.vlgmr.msra.gmra.mrb[4].mxu1 %v1663_v54 }
 0x4d0   : > { %v2083_v55 = vpop.f32.mrb[4].mxu0  ;;  %v2124_v57 = vpop.f32.mrb[4].mxu1  ;;  %2138 = sbr.rel (%p2544_p6) target bundleno = 1408 (0x580), region = 96 }
 0x4d1   : > { %v2125_v58 = vadd.f32 %v2124_v57, %v2083_v55  ;;  %v2085_v59 = vpop.f32.mrb[5].mxu0  ;;  %v2126_v61 = vpop.f32.mrb[5].mxu1 }
 0x4d2   : > { %v2127_v62 = vadd.f32 %v2126_v61, %v2085_v59  ;;  %v2087_v63 = vpop.f32.mrb[6].mxu0  ;;  %v2128_v0 = vpop.f32.mrb[6].mxu1 }
 0x4d3   : > { %v2131_v1 = vadd.f32 %v2125_v58, %v1659_v56  ;;  %v2088_v2 = vpop.f32.mrb[7].mxu0  ;;  %v2129_v3 = vpop.f32.mrb[7].mxu1 }
 0x4d4   : > { %v2132_v4 = vadd.f32 %v2127_v62, %v1660_v60 }
 0x4d5   : > { %2133 = vst [vmem:[#allocation3] sm:$0xff] %v2131_v1 }
 0x4d6   : > { %2134 = vst [vmem:[#allocation3 + $0x8] sm:$0xff] %v2132_v4 }
 0x4dc   : > { %v2139_v5 = vld [vmem:[#allocation3] sm:$0xff] }
 0x4dd   : > { %v2140_v6 = vld [vmem:[#allocation3 + $0x8] sm:$0xff]  ;;  %v2153_v10 = vadd.f32 %v2146_v8, %v2139_v5 }
 0x4de   : > { %v2154_v11 = vadd.f32 %v2150_v9, %v2140_v6 }
 0x4df   : > { %2155 = vst [vmem:[%s3911_s29 + $0x8] sm:$0xff] %v2153_v10 }
 0x4e0   : > { %v2156_v12 = vmul.f32 %v2154_v11, %v2154_v11 }
 0x4e2   : > { %2157 = vadd.xlane.f32.xlu0 %v2156_v12 }
 0x56f   : > { %v2158_v13 = vpop.xlane.xlu0 %2157 }
 0x570   : > { %v2159_v14 = vmax.f32 %v2158_v13, 1e-24 }
 0x572   : > { %3019 = vrsqrt.f32 %v2159_v14 }
 0x57c   : > { %v3020_v15 = vpop.eup %3019 }
 0x57d   : > { %v2161_v16 = vmul.f32 %v3020_v15, %v2154_v11 }
 0x57f   : > { %2162 = vst [vmem:[%s3911_s29 + $0x10] sm:$0xff] %v2161_v16 }
 0x580 PF: > { %s22_s14 = sadd.s32 1, %s3317_s14   ;;  %s3912_s30 = sld [smem:[#allocation20_spill]] }
 0x581   : > { %p19_p1 = scmp.ge.s32.totalorder %s22_s14, 10   ;;  %s3913_s10 = sld [smem:[#allocation21_spill]] }
 0x582   : > { %s3914_s11 = sld [smem:[#allocation25_spill]]  ;;  %s3915_s24 = sld [smem:[#allocation24_spill]] }
 0x583   : > { %s3916_s12 = smov %s3313_s13  ;;  %21 = sbr.rel (!%p19_p1) target bundleno = 11 (0xb), region = 148 }
 0x588   : > { %s3917_s13 = smov %s3915_s24 }
 0x58a   :  { %2184 = vsyncpa [#allocation5], 1 }
 0x58b   :  { %2186 = vsyncpa [#allocation5 + $0x1], 1 }
 0x58c   :  { %2187 = vsyncpa [#allocation7], 1 }
 0x58d   :  { %2188 = vsyncpa [#allocation10], 1 }

</bundles_post_ra>
